<compile_context>
chip_gen: v5e
topology: v5e:2x2
jax: 0.10.0
libtpu: 0.0.40
codegen_flags: <defaults>
</compile_context>

<pallas_src>
import jax
import jax.numpy as jnp
from jax.experimental import pallas as pl
from jax.experimental.pallas import tpu as pltpu

EPS = 1e-5


def _fold_bn(w, b, gamma, beta, mean, var):
    """Fold eval-mode BatchNorm1d into the preceding Conv1d(kernel=1).

    w: (C_out, C_in) PyTorch layout, b: (C_out,).
    Returns (w_t, b_f): w_t of shape (C_in, C_out) ready for `x @ w_t`, b_f (C_out,).
    """
    scale = gamma / jnp.sqrt(var + EPS)
    w_f = w * scale[:, None]
    b_f = scale * (b - mean) + beta
    return w_f.T, b_f


def _round_up(n, m=128):
    return ((n + m - 1) // m) * m


def _pad_to(x, target, axis):
    pad = target - x.shape[axis]
    if pad == 0:
        return x
    widths = [(0, 0)] * x.ndim
    widths[axis] = (0, pad)
    return jnp.pad(x, widths)


# ---------------------------------------------------------------------------
# Fused PointGenCon decoder kernel. One grid step = one primitive, all batches.
#   h1 = relu(g0*W1g[0] + g1*W1g[1] + c1)    # c1 = latent@W1x + b1 (precomputed outside)
#   h2 = relu(h1 @ W2 + b2)
#   h3 = relu(h2 @ W3 + b3)
#   y  = tanh(h3 @ W4 + b4)                  # written lane-dense as (B, 3, Np)
# ---------------------------------------------------------------------------
def _pointgen_kernel(grid_ref, c1_ref, w1g_ref,
                     w2_ref, b2_ref, w3_ref, b3_ref, w4_ref, b4_ref,
                     out_ref):
    g = grid_ref[0]                                  # (B, Np, 2)  f32
    bb, npts, _ = g.shape
    w1g = w1g_ref[0]                                 # (2, C1p)    f32
    c1 = c1_ref[0][:, None, :]                       # (B, 1, C1p) f32

    # Layer 1: K=2 contraction as two VPU broadcast FMAs (no degenerate MXU pass);
    # latent contribution (c1) and bias b1 were folded in outside the kernel.
    h = g[:, :, 0:1] * w1g[0:1, :] + g[:, :, 1:2] * w1g[1:2, :] + c1
    h = jnp.maximum(h, 0.0).astype(jnp.bfloat16)     # (B, Np, C1p)
    h = h.reshape(bb * npts, -1)                     # (B*Np, C1p) — M = B*Np for the MXU

    h = jnp.maximum(
        jnp.dot(h, w2_ref[0], preferred_element_type=jnp.float32) + b2_ref[0],
        0.0).astype(jnp.bfloat16)                    # (B*Np, C2p)
    h = jnp.maximum(
        jnp.dot(h, w3_ref[0], preferred_element_type=jnp.float32) + b3_ref[0],
        0.0).astype(jnp.bfloat16)                    # (B*Np, C3p)

    y = jnp.dot(h, w4_ref[0], preferred_element_type=jnp.float32) + b4_ref[0]
    y = jnp.tanh(y)                                  # (B*Np, 3) f32 (v5e-safe EUP path)

    # Lane-dense writeback: (B, Np, 3) -> (B, 3, Np) via cheap XLU minor-dim transpose.
    out_ref[...] = jnp.transpose(y.reshape(bb, npts, 3), (0, 2, 1))


def atlasnet_decode(latent, rand_grid, folded, *, num_points, nb_primitives):
    """latent: (B, bottleneck) f32; rand_grid: (P, B, Np, 2) f32 in [0,1)."""
    B, L = latent.shape
    P = nb_primitives
    Np = num_points // P
    w1g, w1x, b1 = folded["l1"]
    w2, b2 = folded["l2"]
    w3, b3 = folded["l3"]
    w4, b4 = folded["l4"]
    C1p, C2p, C3p = w1g.shape[-1], w2.shape[-1], w3.shape[-1]

    # Hoisted per-(primitive, batch) latent contribution of layer 1 (tiny wrapper einsum):
    # c1[p, b, :] = latent[b] @ W1x[p] + b1[p].  Keeps W1x out of the kernel entirely.
    c1 = jnp.einsum("bl,plc->pbc", latent, w1x) + b1[:, None, :]      # (P, B, C1p) f32

    out_t = pl.pallas_call(
        _pointgen_kernel,
        out_shape=jax.ShapeDtypeStruct((B, 3, num_points), jnp.float32),
        grid=(P,),
        in_specs=[
            pl.BlockSpec((1, B, Np, 2), lambda p: (p, 0, 0, 0)),   # rand_grid
            pl.BlockSpec((1, B, C1p), lambda p: (p, 0, 0)),        # c1 (latent part + b1)
            pl.BlockSpec((1, 2, C1p), lambda p: (p, 0, 0)),        # W1 grid rows
            pl.BlockSpec((1, C1p, C2p), lambda p: (p, 0, 0)),      # W2
            pl.BlockSpec((1, 1, C2p), lambda p: (p, 0, 0)),        # b2
            pl.BlockSpec((1, C2p, C3p), lambda p: (p, 0, 0)),      # W3
            pl.BlockSpec((1, 1, C3p), lambda p: (p, 0, 0)),        # b3
            pl.BlockSpec((1, C3p, 3), lambda p: (p, 0, 0)),        # W4
            pl.BlockSpec((1, 1, 3), lambda p: (p, 0, 0)),          # b4
        ],
        out_specs=pl.BlockSpec((B, 3, Np), lambda p: (0, 0, p)),
        compiler_params=pltpu.CompilerParams(
            dimension_semantics=("parallel",),
            vmem_limit_bytes=48 * 1024 * 1024),
    )(rand_grid, c1, w1g, w2, b2, w3, b3, w4, b4)

    # torch layout: cat(outs, 2).transpose(2, 1) -> (B, num_points, 3)
    return jnp.transpose(out_t, (0, 2, 1))


# ---------------------------------------------------------------------------
# Parameter construction (deterministic, synthetic) and folding
# ---------------------------------------------------------------------------
def init_params(key, bottleneck_size, nb_primitives):
    bs = bottleneck_size + 2            # PointGenCon bottleneck_size = 2 + latent dim
    ks = iter(jax.random.split(key, 128))

    def lin(cout, cin):
        w = 0.05 * jax.random.normal(next(ks), (cout, cin), jnp.float32)
        b = 0.01 * jax.random.normal(next(ks), (cout,), jnp.float32)
        return w, b

    def bn(c):
        gamma = 1.0 + 0.1 * jax.random.normal(next(ks), (c,), jnp.float32)
        beta = 0.05 * jax.random.normal(next(ks), (c,), jnp.float32)
        mean = 0.05 * jax.random.normal(next(ks), (c,), jnp.float32)
        var = jax.random.uniform(next(ks), (c,), jnp.float32, 0.5, 1.5)
        return gamma, beta, mean, var

    prims = []
    for _ in range(nb_primitives):
        prims.append(dict(
            conv1=lin(bs, bs), bn1=bn(bs),
            conv2=lin(bs // 2, bs), bn2=bn(bs // 2),
            conv3=lin(bs // 4, bs // 2), bn3=bn(bs // 4),
            conv4=lin(3, bs // 4),
        ))
    return prims


def fold_params(prims):
    """Fold eval-mode BN, split W1 into (grid, latent) input parts, zero-pad channel
    dims to multiples of 128 (padding contributes exactly 0), stack over primitives,
    and cast MXU weights to bf16 once (biases / layer-1 FMA weights stay f32)."""
    bs = prims[0]["conv1"][0].shape[0]
    C1, C2, C3 = bs, bs // 2, bs // 4
    C1p, C2p, C3p = _round_up(C1), _round_up(C2), _round_up(C3)

    w1g_l, w1x_l, b1_l = [], [], []
    w2_l, b2_l, w3_l, b3_l, w4_l, b4_l = [], [], [], [], [], []
    for p in prims:
        wt1, bf1 = _fold_bn(*p["conv1"], *p["bn1"])           # (bs, C1), (C1,)
        wt1 = _pad_to(wt1, C1p, 1)
        w1g_l.append(wt1[:2])                                  # grid rows   (2, C1p)
        w1x_l.append(wt1[2:])                                  # latent rows (L, C1p)
        b1_l.append(_pad_to(bf1, C1p, 0))

        wt2, bf2 = _fold_bn(*p["conv2"], *p["bn2"])            # (C1, C2)
        w2_l.append(_pad_to(_pad_to(wt2, C1p, 0), C2p, 1))
        b2_l.append(_pad_to(bf2, C2p, 0))

        wt3, bf3 = _fold_bn(*p["conv3"], *p["bn3"])            # (C2, C3)
        w3_l.append(_pad_to(_pad_to(wt3, C2p, 0), C3p, 1))
        b3_l.append(_pad_to(bf3, C3p, 0))

        w4, b4 = p["conv4"]                                    # (3, C3), (3,)
        w4_l.append(_pad_to(w4.T, C3p, 0))                     # (C3p, 3)
        b4_l.append(b4)

    f32, bf16 = jnp.float32, jnp.bfloat16
    return {
        "l1": (jnp.stack(w1g_l).astype(f32),                   # (P, 2, C1p)  VPU FMA
               jnp.stack(w1x_l).astype(f32),                   # (P, L, C1p)  wrapper einsum
               jnp.stack(b1_l).astype(f32)),                   # (P, C1p)
        "l2": (jnp.stack(w2_l).astype(bf16), jnp.stack(b2_l)[:, None, :].astype(f32)),
        "l3": (jnp.stack(w3_l).astype(bf16), jnp.stack(b3_l)[:, None, :].astype(f32)),
        "l4": (jnp.stack(w4_l).astype(bf16), jnp.stack(b4_l)[:, None, :].astype(f32)),
    }


# ---------------------------------------------------------------------------
# Pure-JAX f32 reference following the torch graph literally (concat + 1x1 convs)
# ---------------------------------------------------------------------------
def reference_decode(latent, rand_grid, prims, *, num_points, nb_primitives):
    B, L = latent.shape
    Np = num_points // nb_primitives
    outs = []
    for i, p in enumerate(prims):
        wt1, bf1 = _fold_bn(*p["conv1"], *p["bn1"])
        wt2, bf2 = _fold_bn(*p["conv2"], *p["bn2"])
        wt3, bf3 = _fold_bn(*p["conv3"], *p["bn3"])
        w4, b4 = p["conv4"]
        g = rand_grid[i]                                               # (B, Np, 2)
        y = jnp.concatenate(
            [g, jnp.broadcast_to(latent[:, None, :], (B, Np, L))], axis=-1)
        h = jnp.maximum(y @ wt1 + bf1, 0.0)
        h = jnp.maximum(h @ wt2 + bf2, 0.0)
        h = jnp.maximum(h @ wt3 + bf3, 0.0)
        outs.append(jnp.tanh(h @ w4.T + b4))                           # (B, Np, 3)
    # torch.cat(outs, 2).transpose(2, 1)  ==  concat over the point axis here
    return jnp.concatenate(outs, axis=1)                               # (B, N, 3)


if __name__ == "__main__":
    # Small shapes consistent with the module defaults (2048 pts, 1024 bottleneck, 5 prims)
    B = 2
    BOTTLENECK = 128
    NB_PRIMITIVES = 5
    NUM_POINTS = 640          # 128 points per primitive

    key = jax.random.PRNGKey(0)
    k_lat, k_grid, k_p = jax.random.split(key, 3)
    # Latent code (output of the resnet18 encoder in the torch module) — see TODO above.
    latent = jax.random.normal(k_lat, (B, BOTTLENECK), jnp.float32)
    # rand_grid.data.uniform_(0, 1) per primitive, laid out (P, B, Np, 2)
    rand_grid = jax.random.uniform(
        k_grid, (NB_PRIMITIVES, B, NUM_POINTS // NB_PRIMITIVES, 2), jnp.float32)

    prims = init_params(k_p, BOTTLENECK, NB_PRIMITIVES)
    folded = fold_params(prims)

    out = atlasnet_decode(latent, rand_grid, folded,
                          num_points=NUM_POINTS, nb_primitives=NB_PRIMITIVES)
    out = jax.block_until_ready(out)
    assert out.shape == (B, NUM_POINTS, 3), out.shape

    ref = jax.block_until_ready(
        reference_decode(latent, rand_grid, prims,
                         num_points=NUM_POINTS, nb_primitives=NB_PRIMITIVES))
    max_err = float(jnp.max(jnp.abs(out - ref)))
    assert max_err < 3e-2, f"mismatch vs f32 reference: {max_err}"

    print("KERNEL_OK")
</pallas_src>

<mosaic_0001>
module attributes {stable_mosaic.version = 11 : i64} {
  func.func @_pointgen_kernel(%arg0: i32, %arg1: memref<1x2x128x2xf32, #tpu.memory_space<vmem>>, %arg2: memref<1x2x256xf32, #tpu.memory_space<vmem>>, %arg3: memref<1x2x256xf32, #tpu.memory_space<vmem>>, %arg4: memref<1x256x128xbf16, #tpu.memory_space<vmem>>, %arg5: memref<1x1x128xf32, #tpu.memory_space<vmem>>, %arg6: memref<1x128x128xbf16, #tpu.memory_space<vmem>>, %arg7: memref<1x1x128xf32, #tpu.memory_space<vmem>>, %arg8: memref<1x128x3xbf16, #tpu.memory_space<vmem>>, %arg9: memref<1x1x3xf32, #tpu.memory_space<vmem>>, %arg10: memref<2x3x128xf32, #tpu.memory_space<vmem>>) attributes {dimension_semantics = [#tpu.dimension_semantics<parallel>], iteration_bounds = array<i64: 5>, scalar_prefetch = 0 : i64, scratch_operands = 0 : i64, tpu.core_type = #tpu.core_type<tc>, window_params = [{transform_indices = @transform_0, window_bounds = array<i64: 1, 2, 128, 2>}, {transform_indices = @transform_1, window_bounds = array<i64: 1, 2, 256>}, {transform_indices = @transform_2, window_bounds = array<i64: 1, 2, 256>}, {transform_indices = @transform_3, window_bounds = array<i64: 1, 256, 128>}, {transform_indices = @transform_4, window_bounds = array<i64: 1, 1, 128>}, {transform_indices = @transform_5, window_bounds = array<i64: 1, 128, 128>}, {transform_indices = @transform_6, window_bounds = array<i64: 1, 1, 128>}, {transform_indices = @transform_7, window_bounds = array<i64: 1, 128, 3>}, {transform_indices = @transform_8, window_bounds = array<i64: 1, 1, 3>}, {transform_indices = @transform_9, window_bounds = array<i64: 2, 3, 128>}]} {
    %c0 = arith.constant 0 : index
    %c0_0 = arith.constant 0 : index
    %c0_1 = arith.constant 0 : index
    %c0_2 = arith.constant 0 : index
    %0 = vector.load %arg1[%c0, %c0_0, %c0_1, %c0_2] : memref<1x2x128x2xf32, #tpu.memory_space<vmem>>, vector<1x2x128x2xf32>
    %1 = vector.shape_cast %0 : vector<1x2x128x2xf32> to vector<2x128x2xf32>
    %c0_3 = arith.constant 0 : index
    %c0_4 = arith.constant 0 : index
    %c0_5 = arith.constant 0 : index
    %2 = vector.load %arg3[%c0_3, %c0_4, %c0_5] : memref<1x2x256xf32, #tpu.memory_space<vmem>>, vector<1x2x256xf32>
    %3 = vector.shape_cast %2 : vector<1x2x256xf32> to vector<2x256xf32>
    %c0_6 = arith.constant 0 : index
    %c0_7 = arith.constant 0 : index
    %c0_8 = arith.constant 0 : index
    %4 = vector.load %arg2[%c0_6, %c0_7, %c0_8] : memref<1x2x256xf32, #tpu.memory_space<vmem>>, vector<1x2x256xf32>
    %5 = vector.shape_cast %4 : vector<1x2x256xf32> to vector<2x256xf32>
    %6 = vector.shape_cast %5 : vector<2x256xf32> to vector<2x1x256xf32>
    %7 = vector.extract_strided_slice %1 {offsets = [0, 0, 0], sizes = [2, 128, 1], strides = [1, 1, 1]} : vector<2x128x2xf32> to vector<2x128x1xf32>
    %8 = vector.extract_strided_slice %3 {offsets = [0, 0], sizes = [1, 256], strides = [1, 1]} : vector<2x256xf32> to vector<1x256xf32>
    %9 = vector.shape_cast %8 : vector<1x256xf32> to vector<1x1x256xf32>
    %10 = vector.broadcast %7 : vector<2x128x1xf32> to vector<2x128x256xf32>
    %11 = vector.broadcast %9 : vector<1x1x256xf32> to vector<2x128x256xf32>
    %12 = arith.mulf %10, %11 : vector<2x128x256xf32>
    %13 = vector.extract_strided_slice %1 {offsets = [0, 0, 1], sizes = [2, 128, 1], strides = [1, 1, 1]} : vector<2x128x2xf32> to vector<2x128x1xf32>
    %14 = vector.extract_strided_slice %3 {offsets = [1, 0], sizes = [1, 256], strides = [1, 1]} : vector<2x256xf32> to vector<1x256xf32>
    %15 = vector.shape_cast %14 : vector<1x256xf32> to vector<1x1x256xf32>
    %16 = vector.broadcast %13 : vector<2x128x1xf32> to vector<2x128x256xf32>
    %17 = vector.broadcast %15 : vector<1x1x256xf32> to vector<2x128x256xf32>
    %18 = arith.mulf %16, %17 : vector<2x128x256xf32>
    %19 = arith.addf %12, %18 : vector<2x128x256xf32>
    %20 = vector.broadcast %6 : vector<2x1x256xf32> to vector<2x128x256xf32>
    %21 = arith.addf %19, %20 : vector<2x128x256xf32>
    %cst = arith.constant 0.000000e+00 : f32
    %22 = vector.broadcast %cst : f32 to vector<2x128x256xf32>
    %23 = arith.maximumf %21, %22 : vector<2x128x256xf32>
    %24 = arith.truncf %23 : vector<2x128x256xf32> to vector<2x128x256xbf16>
    %25 = vector.shape_cast %24 : vector<2x128x256xbf16> to vector<256x256xbf16>
    %c0_9 = arith.constant 0 : index
    %c0_10 = arith.constant 0 : index
    %c0_11 = arith.constant 0 : index
    %26 = vector.load %arg4[%c0_9, %c0_10, %c0_11] : memref<1x256x128xbf16, #tpu.memory_space<vmem>>, vector<1x256x128xbf16>
    %27 = vector.shape_cast %26 : vector<1x256x128xbf16> to vector<256x128xbf16>
    %cst_12 = arith.constant dense<0.000000e+00> : vector<256x128xf32>
    %28 = tpu.matmul %25, %27, %cst_12 {dimension_numbers = #tpu.dot_dimension_numbers<[1], [0], [0], [1], [0, 0, 1, 1], [], []>} : vector<256x256xbf16>, vector<256x128xbf16>, vector<256x128xf32> -> vector<256x128xf32>
    %c0_13 = arith.constant 0 : index
    %c0_14 = arith.constant 0 : index
    %c0_15 = arith.constant 0 : index
    %29 = vector.load %arg5[%c0_13, %c0_14, %c0_15] : memref<1x1x128xf32, #tpu.memory_space<vmem>>, vector<1x1x128xf32>
    %30 = vector.shape_cast %29 : vector<1x1x128xf32> to vector<1x128xf32>
    %31 = vector.broadcast %30 : vector<1x128xf32> to vector<256x128xf32>
    %32 = arith.addf %28, %31 : vector<256x128xf32>
    %cst_16 = arith.constant 0.000000e+00 : f32
    %33 = vector.broadcast %cst_16 : f32 to vector<256x128xf32>
    %34 = arith.maximumf %32, %33 : vector<256x128xf32>
    %35 = arith.truncf %34 : vector<256x128xf32> to vector<256x128xbf16>
    %c0_17 = arith.constant 0 : index
    %c0_18 = arith.constant 0 : index
    %c0_19 = arith.constant 0 : index
    %36 = vector.load %arg6[%c0_17, %c0_18, %c0_19] : memref<1x128x128xbf16, #tpu.memory_space<vmem>>, vector<1x128x128xbf16>
    %37 = vector.shape_cast %36 : vector<1x128x128xbf16> to vector<128x128xbf16>
    %cst_20 = arith.constant dense<0.000000e+00> : vector<256x128xf32>
    %38 = tpu.matmul %35, %37, %cst_20 {dimension_numbers = #tpu.dot_dimension_numbers<[1], [0], [0], [1], [0, 0, 1, 1], [], []>} : vector<256x128xbf16>, vector<128x128xbf16>, vector<256x128xf32> -> vector<256x128xf32>
    %c0_21 = arith.constant 0 : index
    %c0_22 = arith.constant 0 : index
    %c0_23 = arith.constant 0 : index
    %39 = vector.load %arg7[%c0_21, %c0_22, %c0_23] : memref<1x1x128xf32, #tpu.memory_space<vmem>>, vector<1x1x128xf32>
    %40 = vector.shape_cast %39 : vector<1x1x128xf32> to vector<1x128xf32>
    %41 = vector.broadcast %40 : vector<1x128xf32> to vector<256x128xf32>
    %42 = arith.addf %38, %41 : vector<256x128xf32>
    %cst_24 = arith.constant 0.000000e+00 : f32
    %43 = vector.broadcast %cst_24 : f32 to vector<256x128xf32>
    %44 = arith.maximumf %42, %43 : vector<256x128xf32>
    %45 = arith.truncf %44 : vector<256x128xf32> to vector<256x128xbf16>
    %c0_25 = arith.constant 0 : index
    %c0_26 = arith.constant 0 : index
    %c0_27 = arith.constant 0 : index
    %46 = vector.load %arg8[%c0_25, %c0_26, %c0_27] : memref<1x128x3xbf16, #tpu.memory_space<vmem>>, vector<1x128x3xbf16>
    %47 = vector.shape_cast %46 : vector<1x128x3xbf16> to vector<128x3xbf16>
    %cst_28 = arith.constant dense<0.000000e+00> : vector<256x3xf32>
    %48 = tpu.matmul %45, %47, %cst_28 {dimension_numbers = #tpu.dot_dimension_numbers<[1], [0], [0], [1], [0, 0, 1, 1], [], []>} : vector<256x128xbf16>, vector<128x3xbf16>, vector<256x3xf32> -> vector<256x3xf32>
    %c0_29 = arith.constant 0 : index
    %c0_30 = arith.constant 0 : index
    %c0_31 = arith.constant 0 : index
    %49 = vector.load %arg9[%c0_29, %c0_30, %c0_31] : memref<1x1x3xf32, #tpu.memory_space<vmem>>, vector<1x1x3xf32>
    %50 = vector.shape_cast %49 : vector<1x1x3xf32> to vector<1x3xf32>
    %51 = vector.broadcast %50 : vector<1x3xf32> to vector<256x3xf32>
    %52 = arith.addf %48, %51 : vector<256x3xf32>
    %53 = math.tanh %52 : vector<256x3xf32>
    %54 = vector.shape_cast %53 : vector<256x3xf32> to vector<2x128x3xf32>
    %55 = tpu.transpose %54, [0, 2, 1] : vector<2x128x3xf32> -> vector<2x3x128xf32>
    %c0_32 = arith.constant 0 : index
    %c0_33 = arith.constant 0 : index
    %c0_34 = arith.constant 0 : index
    %56 = vector.load %arg10[%c0_32, %c0_33, %c0_34] : memref<2x3x128xf32, #tpu.memory_space<vmem>>, vector<2x3x128xf32>
    tpu.vector_store %arg10[%c0_32, %c0_33, %c0_34], %55 {strides = array<i32>} : memref<2x3x128xf32, #tpu.memory_space<vmem>>, vector<2x3x128xf32>,
    return
  }
  func.func @transform_0(%arg0: i32) -> (i32, i32, i32, i32) {
    %c0_i32 = arith.constant 0 : i32
    %c0_i32_0 = arith.constant 0 : i32
    %c0_i32_1 = arith.constant 0 : i32
    %c0_i32_2 = arith.constant 0 : i32
    return %arg0, %c0_i32, %c0_i32_0, %c0_i32_1 : i32, i32, i32, i32
  }
  func.func @transform_1(%arg0: i32) -> (i32, i32, i32) {
    %c0_i32 = arith.constant 0 : i32
    %c0_i32_0 = arith.constant 0 : i32
    %c0_i32_1 = arith.constant 0 : i32
    return %arg0, %c0_i32, %c0_i32_0 : i32, i32, i32
  }
  func.func @transform_2(%arg0: i32) -> (i32, i32, i32) {
    %c0_i32 = arith.constant 0 : i32
    %c0_i32_0 = arith.constant 0 : i32
    %c0_i32_1 = arith.constant 0 : i32
    return %arg0, %c0_i32, %c0_i32_0 : i32, i32, i32
  }
  func.func @transform_3(%arg0: i32) -> (i32, i32, i32) {
    %c0_i32 = arith.constant 0 : i32
    %c0_i32_0 = arith.constant 0 : i32
    %c0_i32_1 = arith.constant 0 : i32
    return %arg0, %c0_i32, %c0_i32_0 : i32, i32, i32
  }
  func.func @transform_4(%arg0: i32) -> (i32, i32, i32) {
    %c0_i32 = arith.constant 0 : i32
    %c0_i32_0 = arith.constant 0 : i32
    %c0_i32_1 = arith.constant 0 : i32
    return %arg0, %c0_i32, %c0_i32_0 : i32, i32, i32
  }
  func.func @transform_5(%arg0: i32) -> (i32, i32, i32) {
    %c0_i32 = arith.constant 0 : i32
    %c0_i32_0 = arith.constant 0 : i32
    %c0_i32_1 = arith.constant 0 : i32
    return %arg0, %c0_i32, %c0_i32_0 : i32, i32, i32
  }
  func.func @transform_6(%arg0: i32) -> (i32, i32, i32) {
    %c0_i32 = arith.constant 0 : i32
    %c0_i32_0 = arith.constant 0 : i32
    %c0_i32_1 = arith.constant 0 : i32
    return %arg0, %c0_i32, %c0_i32_0 : i32, i32, i32
  }
  func.func @transform_7(%arg0: i32) -> (i32, i32, i32) {
    %c0_i32 = arith.constant 0 : i32
    %c0_i32_0 = arith.constant 0 : i32
    %c0_i32_1 = arith.constant 0 : i32
    return %arg0, %c0_i32, %c0_i32_0 : i32, i32, i32
  }
  func.func @transform_8(%arg0: i32) -> (i32, i32, i32) {
    %c0_i32 = arith.constant 0 : i32
    %c0_i32_0 = arith.constant 0 : i32
    %c0_i32_1 = arith.constant 0 : i32
    return %arg0, %c0_i32, %c0_i32_0 : i32, i32, i32
  }
  func.func @transform_9(%arg0: i32) -> (i32, i32, i32) {
    %c0_i32 = arith.constant 0 : i32
    %c0_i32_0 = arith.constant 0 : i32
    %c0_i32_1 = arith.constant 0 : i32
    return %c0_i32, %c0_i32_0, %arg0 : i32, i32, i32
  }
}

</mosaic_0001>

<bundles_post_ra>
// kernel: tpu_custom_call.1
= control target key start
LH: loop header
LB: loop body
LE: loop exit
PB: predicated region body
PF: predicated region fallthrough
CT: control target
= control target key end

     0   :  { %s2745_s30 = smov 0   ;;  %s2747_s10 = smov 0   ;;  %s3295_s0 = inlined_call_operand.vmem [shape: f32[5,2,128,2], index: 0, kind: input, shape index: {}]   ;;  %s3296_s1 = inlined_call_operand.vmem [shape: f32[5,2,256], index: 1, kind: input, shape index: {}]   ;;  %s3297_s2 = inlined_call_operand.vmem [shape: f32[5,2,256], index: 2, kind: input, shape index: {}]   ;;  %s3298_s3 = inlined_call_operand.vmem [shape: bf16[5,256,128], index: 3, kind: input, shape index: {}]   ;;  %s3299_s4 = inlined_call_operand.vmem [shape: f32[5,1,128], index: 4, kind: input, shape index: {}]   ;;  %s3300_s5 = inlined_call_operand.vmem [shape: bf16[5,128,128], index: 5, kind: input, shape index: {}]   ;;  %s3301_s6 = inlined_call_operand.vmem [shape: f32[5,1,128], index: 6, kind: input, shape index: {}]   ;;  %s3302_s7 = inlined_call_operand.vmem [shape: bf16[5,128,3], index: 7, kind: input, shape index: {}]   ;;  %s3303_s8 = inlined_call_operand.vmem [shape: f32[5,1,3], index: 8, kind: input, shape index: {}]   ;;  %s3304_s9 = inlined_call_operand.vmem [shape: f32[2,3,640], index: 9, kind: output, shape index: {}]  }
   0x1   :  { %s2749_s11 = smov 0  }
   0x2 LB: > { %s2758_s12 = sadd.s32 4294967295, %s2691_s11   ;;  %s2760_s13 = sadd.s32 1, %s2691_s11   ;;  %s2691_s11 = sphi %s2749_s11, %s3308_s11   ;;  %s2687_s10 = sphi %s2747_s10, %s3307_s10   ;;  %s2683_s30 = sphi %s2745_s30, %s3306_s30  }
   0x3   : > { %s257_s14 = ssub.s32 %s2691_s11, %s2760_s13  ;;  %s260_s15 = sadd.s32 1, %s2687_s10 }
   0x4   : > { %p258_p0 = scmp.eq.s32.totalorder %s257_s14, 0  ;;  %p270_p1 = scmp.ne.s32.totalorder %s2687_s10, %s2683_s30 }
   0x5   : > { %p271_p2 = scmp.eq.s32.totalorder %s2758_s12, 4  ;;  %p2354_p3 = scmp.ge.s32.totalorder %s2691_s11, 1 }
   0x6   : > { %s2768_s16 = scalar_select %p258_p0, %s2687_s10, %s260_s15  }
   0x7   : > { %p2770_p4 = por %p271_p2, %p270_p1  ;;  %p361_p5 = scmp.lt.s32.totalorder %s2691_s11, 6 }
   0x9   : > { %p362_p6 = pnand %p2354_p3, %p361_p5 }
   0xa   : > { %p430_p7 = scmp.lt.s32.totalorder (!%p362_p6), %s2758_s12, 4 }
   0xb   : > { %365 = sbr.rel (%p362_p6) target bundleno = 889 (0x379), region = 56 }
  0x10   : > { %v2693_v0 = vmov 1   ;;  %v2694_v1 = vmov 0   ;;  %s2778_s18 = scalar_select %p430_p7, %s2758_s12, 4  ;;  %vm507_vm0 = vcmask 1040384   ;;  %vm509_vm1 = vcmask 1042434  }
  0x11   : > { %2565 = vset.pattern.permute.xlu1 %v2693_v0  ;;  %2564 = vset.pattern.permute.xlu0 %v2694_v1  ;;  %vm511_vm2 = vcmask 1041408   ;;  %vm513_vm3 = vcmask 1041409   ;;  %vm515_vm4 = vcmask 1043459   ;;  %vm517_vm5 = vcmask 1042433  }
  0x12   : > { %2566 = vset.pattern.permute.xlu2 %v2694_v1  ;;  %s2500_s19 = sshll.u32 %s2778_s18, 8  ;;  %s452_s22 = scalar_lea.vmem %s3299_s4, %s2778_s18 }
  0x13   : > { %s2789_s25 = scalar_lea.vmem %s3295_s0, %s2500_s19  ;;  %s460_s28 = scalar_lea.vmem %s3301_s6, %s2778_s18 }
  0x14   : > { %s468_s14 = scalar_lea.vmem %s3303_s8, %s2778_s18  ;;  %v469_v2 = vld [vmem:[%s2789_s25] sm:$0xff]  ;;  %v471_v3 = vld [vmem:[%s2789_s25 + $0x10] sm:$0xff]  ;;  %v470_v4 = vld [vmem:[%s2789_s25 + $0x8] sm:$0xff]  ;;  %s2503_s15 = sshll.u32 %s2778_s18, 7 }
  0x15   : > { %752 = vperm.xlu1 %2565, %v469_v2   ;;  %522 = vperm.xlu0 %2564, %v469_v2   ;;  %v472_v5 = vld [vmem:[%s2789_s25 + $0x18] sm:$0xff]  ;;  %v473_v6 = vld [vmem:[%s2789_s25 + $0x20] sm:$0xff]  ;;  %v474_v7 = vld [vmem:[%s2789_s25 + $0x28] sm:$0xff]  ;;  %s2824_s21 = scalar_lea.vmem %s3298_s3, %s2503_s15  ;;  %s2501_s23 = sshll.u32 %s2778_s18, 2 }
  0x16   : > { %532 = vperm.xlu2 %2566, %v471_v3   ;;  %v475_v8 = vld [vmem:[%s2789_s25 + $0x30] sm:$0xff]  ;;  %v476_v9 = vld [vmem:[%s2789_s25 + $0x38] sm:$0xff]  ;;  %v478_v10 = vld [vmem:[%s2789_s25 + $0x48] sm:$0xff]  ;;  %s444_s27 = scalar_lea.vmem %s3297_s2, %s2501_s23  ;;  %s439_s15 = scalar_lea.vmem %s3296_s1, %s2501_s23 }
  0x17   : > { %v477_v11 = vld [vmem:[%s2789_s25 + $0x40] sm:$0xff]  ;;  %v479_v12 = vld [vmem:[%s2789_s25 + $0x50] sm:$0xff]  ;;  %v482_v13 = vld [vmem:[%s2789_s25 + $0x68] sm:$0xff] }
  0x18   : > { %v480_v14 = vld [vmem:[%s2789_s25 + $0x58] sm:$0xff]  ;;  %v483_v17 = vld [vmem:[%s2789_s25 + $0x70] sm:$0xff]  ;;  %v481_v18 = vld [vmem:[%s2789_s25 + $0x60] sm:$0xff] }
  0x19   : > { %v2513_v15 = vld [vmem:[%s2824_s21 + $0x38] sm:$0xff]  ;;  %v2512_v19 = vld [vmem:[%s2824_s21 + $0x30] sm:$0xff]  ;;  %v2511_v21 = vld [vmem:[%s2824_s21 + $0x28] sm:$0xff] }
  0x1a   : > { %v2521_v16 = vld [vmem:[%s2824_s21 + $0x78] sm:$0xff]  ;;  %1473 = vmatpush.bf16.msra.mxu0 %v2513_v15  ;;  %v2520_v20 = vld [vmem:[%s2824_s21 + $0x70] sm:$0xff]  ;;  %v2519_v22 = vld [vmem:[%s2824_s21 + $0x68] sm:$0xff] }
  0x1b   : > { %1562 = vmatpush.bf16.msra.mxu1 %v2521_v16  ;;  %v2510_v23 = vld [vmem:[%s2824_s21 + $0x20] sm:$0xff]  ;;  %v486_v25 = vld [vmem:[%s2789_s25 + $0x88] sm:$0xff]  ;;  %v484_v26 = vld [vmem:[%s2789_s25 + $0x78] sm:$0xff] }
  0x1c   : > { %v2518_v24 = vld [vmem:[%s2824_s21 + $0x60] sm:$0xff]  ;;  %v2509_v27 = vld [vmem:[%s2824_s21 + $0x18] sm:$0xff]  ;;  %v2508_v29 = vld [vmem:[%s2824_s21 + $0x10] sm:$0xff] }
  0x1d   : > { %756 = vperm.xlu1 %2565, %v470_v4   ;;  %527 = vperm.xlu0 %2564, %v470_v4   ;;  %v2517_v28 = vld [vmem:[%s2824_s21 + $0x58] sm:$0xff]  ;;  %v2516_v30 = vld [vmem:[%s2824_s21 + $0x50] sm:$0xff]  ;;  %v485_v31 = vld [vmem:[%s2789_s25 + $0x80] sm:$0xff] }
  0x1e   : > { %537 = vperm.xlu2 %2566, %v472_v5   ;;  %1474 = vmatpush.bf16.msra.mxu0 %v2512_v19  ;;  %v487_v32 = vld [vmem:[%s2789_s25 + $0x90] sm:$0xff]  ;;  %v2507_v33 = vld [vmem:[%s2824_s21 + $0x8] sm:$0xff]  ;;  %v2506_v35 = vld [vmem:[%s2824_s21] sm:$0xff] }
  0x1f   : > { %1563 = vmatpush.bf16.msra.mxu1 %v2520_v20  ;;  %v2515_v34 = vld [vmem:[%s2824_s21 + $0x48] sm:$0xff]  ;;  %v2514_v36 = vld [vmem:[%s2824_s21 + $0x40] sm:$0xff]  ;;  %v2891_v54 = vld [vmem:[%s2789_s25 + $0xb0] sm:$0xff] }
  0x20   : > { %v501_v37 = vld [vmem:[%s444_s27] sm:$0xf]  ;;  %v2867_v39 = vld [vmem:[%s2789_s25 + $0xa8] sm:$0xff]  ;;  %v488_v56 = vld [vmem:[%s2789_s25 + $0x98] sm:$0xff] }
  0x21   : > { %v2864_v38 = vld [vmem:[%s439_s15] sm:$0xf]  ;;  %v681_v40 = vperm.slane %v501_v37, 0  ;;  %v682_v41 = vperm.slane %v501_v37, 2  ;;  %v879_v45 = vperm.slane %v501_v37, 1  ;;  %v880_v46 = vperm.slane %v501_v37, 3 }
  0x22   : > { %1475 = vmatpush.bf16.msra.mxu0 %v2511_v21  ;;  %v504_v42 = vrot.slane %v2864_v38, 1  ;;  %v505_v43 = vrot.slane %v2864_v38, 2  ;;  %v506_v44 = vrot.slane %v2864_v38, 3 }
  0x23   : > { %1564 = vmatpush.bf16.msra.mxu1 %v2519_v22  ;;  %v2882_v49 = vperm.slane %v681_v40, 0  ;;  %v2884_v50 = vperm.slane %v682_v41, 0  ;;  %v2886_v52 = vperm.slane %v879_v45, 1  ;;  %v2888_v53 = vperm.slane %v880_v46, 1 }
  0x24   : > { %v508_v47 = vsel %vm507_vm0, %v2864_v38, %v504_v42  ;;  %v510_v48 = vsel %vm509_vm1, %v505_v43, %v506_v44 }
  0x25   : > { %764 = vperm.xlu1 %2565, %v472_v5   ;;  %2567 = vset.pattern.permute.xlu0 %v2693_v0  ;;  %v512_v55 = vsel %vm511_vm2, %v508_v47, %v510_v48 }
  0x26   : > { %760 = vperm.xlu0 %2567, %v471_v3   ;;  %542 = vperm.xlu2 %2566, %v473_v6   ;;  %v2900_v63 = vperm.slane %v512_v55, 0  ;;  %v2902_v2 = vperm.slane %v512_v55, 1 }
  0x27   : > { %1476 = vmatpush.bf16.msra.mxu0 %v2510_v23  ;;  %1565 = vmatpush.bf16.msra.mxu1 %v2518_v24 }
  0x2b   : > { %1477 = vmatpush.bf16.msra.mxu0 %v2509_v27  ;;  %1566 = vmatpush.bf16.msra.mxu1 %v2517_v28 }
  0x2d   : > { %2568 = vset.pattern.permute.xlu1 %v2694_v1 }
  0x2e   : > { %547 = vperm.xlu1 %2568, %v474_v7   ;;  %772 = vperm.xlu0 %2567, %v474_v7  }
  0x2f   : > { %2569 = vset.pattern.permute.xlu2 %v2693_v0  ;;  %1478 = vmatpush.bf16.msra.mxu0 %v2508_v29 }
  0x30   : > { %768 = vperm.xlu2 %2569, %v473_v6   ;;  %1567 = vmatpush.bf16.msra.mxu1 %v2516_v30 }
  0x33   : > { %1479 = vmatpush.bf16.msra.mxu0 %v2507_v33 }
  0x34   : > { %1568 = vmatpush.bf16.msra.mxu1 %v2515_v34 }
  0x36   : > { %552 = vperm.xlu1 %2568, %v475_v8   ;;  %776 = vperm.xlu0 %2567, %v475_v8  }
  0x37   : > { %1480 = vmatpush.bf16.msra.mxu0 %v2506_v35 }
  0x38   : > { %2570 = vset.pattern.permute.xlu2 %v2694_v1  ;;  %1569 = vmatpush.bf16.msra.mxu1 %v2514_v36 }
  0x39   : > { %557 = vperm.xlu2 %2570, %v476_v9  }
  0x3e   : > { %2571 = vset.pattern.permute.xlu1 %v2693_v0  ;;  %2572 = vset.pattern.permute.xlu0 %v2694_v1 }
  0x3f   : > { %780 = vperm.xlu1 %2571, %v476_v9   ;;  %567 = vperm.xlu0 %2572, %v478_v10  }
  0x41   : > { %562 = vperm.xlu2 %2570, %v477_v11  }
  0x47   : > { %784 = vperm.xlu1 %2571, %v477_v11   ;;  %2576 = vset.pattern.permute.xlu0 %v2693_v0 }
  0x48   : > { %792 = vperm.xlu0 %2576, %v479_v12  }
  0x49   : > { %2573 = vset.pattern.permute.xlu2 %v2693_v0 }
  0x4a   : > { %788 = vperm.xlu2 %2573, %v478_v10  }
  0x4f   : > { %2574 = vset.pattern.permute.xlu1 %v2694_v1 }
  0x50   : > { %572 = vperm.xlu1 %2574, %v479_v12   ;;  %804 = vperm.xlu0 %2576, %v482_v13  }
  0x52   : > { %2575 = vset.pattern.permute.xlu2 %v2694_v1 }
  0x53   : > { %577 = vperm.xlu2 %2575, %v480_v14  }
  0x58   : > { %2577 = vset.pattern.permute.xlu1 %v2693_v0  ;;  %808 = vperm.xlu0 %2576, %v483_v17  }
  0x59   : > { %796 = vperm.xlu1 %2577, %v480_v14  }
  0x5b   : > { %582 = vperm.xlu2 %2575, %v481_v18  }
  0x60   : > { %2582 = vset.pattern.permute.xlu0 %v2694_v1 }
  0x61   : > { %2578 = vset.pattern.permute.xlu1 %v2694_v1  ;;  %607 = vperm.xlu0 %2582, %v486_v25  }
  0x62   : > { %587 = vperm.xlu1 %2578, %v482_v13  }
  0x63   : > { %2579 = vset.pattern.permute.xlu2 %v2693_v0 }
  0x64   : > { %800 = vperm.xlu2 %2579, %v481_v18   ;;  %v489_v18 = vld [vmem:[%s2789_s25 + $0xa0] sm:$0xff] }
  0x69   : > { %2586 = vset.pattern.permute.xlu0 %v2693_v0 }
  0x6a   : > { %592 = vperm.xlu1 %2578, %v483_v17   ;;  %824 = vperm.xlu0 %2586, %v487_v32  }
  0x6c   : > { %2580 = vset.pattern.permute.xlu2 %v2694_v1 }
  0x6d   : > { %597 = vperm.xlu2 %2580, %v484_v26  }
  0x70   : > { %v533_v51 = vpop.permute.xlu2 %532 }
  0x71   : > { %v692_v28 = vmul.f32 %v2884_v50, %v533_v51 }
  0x72   : > { %2581 = vset.pattern.permute.xlu1 %v2693_v0  ;;  %836 = vperm.xlu0 %2586, %v2867_v39  }
  0x73   : > { %812 = vperm.xlu1 %2581, %v484_v26   ;;  %v691_v26 = vmul.f32 %v2882_v49, %v533_v51 }
  0x75   : > { %602 = vperm.xlu2 %2580, %v485_v31  }
  0x78   : > { %v538_v7 = vpop.permute.xlu2 %537 }
  0x79   : > { %v693_v22 = vmul.f32 %v2882_v49, %v538_v7  ;;  %v694_v23 = vmul.f32 %v2884_v50, %v538_v7 }
  0x7a   : > { %840 = vperm.xlu0 %2586, %v2891_v54  }
  0x7b   : > { %816 = vperm.xlu1 %2581, %v485_v31  }
  0x7d   : > { %2583 = vset.pattern.permute.xlu2 %v2693_v0 }
  0x7e   : > { %820 = vperm.xlu2 %2583, %v486_v25  }
  0x80   : > { %v543_v29 = vpop.permute.xlu2 %542 }
  0x82   : > { %2592 = vset.pattern.permute.xlu0 %v2694_v1 }
  0x83   : > { %2584 = vset.pattern.permute.xlu1 %v2694_v1 }
  0x84   : > { %612 = vperm.xlu1 %2584, %v487_v32  }
  0x86   : > { %2585 = vset.pattern.permute.xlu2 %v2694_v1 }
  0x87   : > { %v753_v57 = vpop.permute.xlu1 %752  ;;  %v523_v58 = vpop.permute.xlu0 %522  ;;  %617 = vperm.xlu2 %2585, %v488_v56  }
  0x88   : > { %v885_v59 = vmul.f32 %v2886_v52, %v753_v57  ;;  %v886_v60 = vmul.f32 %v2888_v53, %v753_v57  ;;  %v687_v61 = vmul.f32 %v2882_v49, %v523_v58  ;;  %v688_v62 = vmul.f32 %v2884_v50, %v523_v58 }
  0x8a   : > { %v949_v3 = vadd.f32 %v885_v59, %v687_v61  ;;  %v950_v4 = vadd.f32 %v886_v60, %v688_v62 }
  0x8c   : > { %2587 = vset.pattern.permute.xlu1 %v2693_v0  ;;  %v1021_v5 = vadd.f32 %v2900_v63, %v949_v3  ;;  %v1022_v6 = vadd.f32 %v2902_v2, %v950_v4 }
  0x8d   : > { %828 = vperm.xlu1 %2587, %v488_v56  }
  0x8e   : > { %v1085_v14 = vmax.f32 %v1021_v5, 0.0  ;;  %v1086_v15 = vmax.f32 %v1022_v6, 0.0  ;;  %v769_v5 = vpop.permute.xlu2 %768 }
  0x8f   : > { %v757_v8 = vpop.permute.xlu1 %756  ;;  %v528_v9 = vpop.permute.xlu0 %527  ;;  %622 = vperm.xlu2 %2585, %v489_v18  }
  0x90   : > { %v887_v10 = vmul.f32 %v2886_v52, %v757_v8  ;;  %v888_v11 = vmul.f32 %v2888_v53, %v757_v8  ;;  %v689_v12 = vmul.f32 %v2882_v49, %v528_v9  ;;  %v690_v13 = vmul.f32 %v2884_v50, %v528_v9  ;;  %v494_v8 = vld [vmem:[%s2789_s25 + $0xc8] sm:$0xff] }
  0x91   : > { %v1149_v21 = vpack.c.bf16 %v1086_v15, %v1085_v14  ;;  %647 = vperm.xlu0 %2592, %v494_v8   ;;  %v893_v14 = vmul.f32 %v2886_v52, %v769_v5  ;;  %v894_v15 = vmul.f32 %v2888_v53, %v769_v5 }
  0x92   : > { %v951_v16 = vadd.f32 %v887_v10, %v689_v12  ;;  %v952_v17 = vadd.f32 %v888_v11, %v690_v13  ;;  %v696_v13 = vmul.f32 %v2884_v50, %v543_v29 }
  0x93   : > { %v1249_v36 = vunpack.c.l.b16 %v1149_v21  ;;  %v1250_v37 = vunpack.c.h.b16 %v1149_v21 }
  0x94   : > { %v1023_v19 = vadd.f32 %v2900_v63, %v951_v16  ;;  %v1024_v20 = vadd.f32 %v2902_v2, %v952_v17  ;;  %v492_v16 = vld [vmem:[%s2789_s25 + $0xb8] sm:$0xff] }
  0x95   : > { %2588 = vset.pattern.permute.xlu1 %v2694_v1 }
  0x96   : > { %v1087_v24 = vmax.f32 %v1023_v19, 0.0  ;;  %v1088_v25 = vmax.f32 %v1024_v20, 0.0  ;;  %627 = vperm.xlu1 %2588, %v2867_v39  }
  0x97   : > { %v765_v27 = vpop.permute.xlu1 %764  ;;  %2589 = vset.pattern.permute.xlu2 %v2693_v0 }
  0x98   : > { %v891_v30 = vmul.f32 %v2886_v52, %v765_v27  ;;  %v892_v31 = vmul.f32 %v2888_v53, %v765_v27  ;;  %v761_v32 = vpop.permute.xlu0 %760  ;;  %v1150_v33 = vpack.c.bf16 %v1088_v25, %v1087_v24  ;;  %832 = vperm.xlu2 %2589, %v489_v18   ;;  %v958_v25 = vadd.f32 %v894_v15, %v696_v13 }
  0x99   : > { %v889_v34 = vmul.f32 %v2886_v52, %v761_v32  ;;  %v890_v35 = vmul.f32 %v2888_v53, %v761_v32  ;;  %2596 = vset.pattern.permute.xlu0 %v2693_v0 }
  0x9a   : > { %v955_v40 = vadd.f32 %v891_v30, %v693_v22  ;;  %v956_v39 = vadd.f32 %v892_v31, %v694_v23  ;;  %v1251_v41 = vunpack.c.l.b16 %v1150_v33  ;;  %v1252_v45 = vunpack.c.h.b16 %v1150_v33  ;;  %v495_v31 = vld [vmem:[%s2789_s25 + $0xd0] sm:$0xff] }
  0x9b   : > { %v953_v46 = vadd.f32 %v889_v34, %v691_v26  ;;  %v954_v47 = vadd.f32 %v890_v35, %v692_v28  ;;  %v558_v26 = vpop.permute.xlu2 %557  ;;  %v1030_v33 = vadd.f32 %v2902_v2, %v958_v25  ;;  %v493_v34 = vld [vmem:[%s2789_s25 + $0xc0] sm:$0xff]  ;;  %856 = vperm.xlu0 %2596, %v495_v31  }
  0x9c   : > { %v1027_v48 = vadd.f32 %v2900_v63, %v955_v40  ;;  %v1028_v51 = vadd.f32 %v2902_v2, %v956_v39  ;;  %v1313_v55 = vpack.c.b16 %v1251_v41, %v1249_v36  ;;  %v1314_v56 = vpack.c.b16 %v1252_v45, %v1250_v37 }
  0x9d   : > { %v1025_v57 = vadd.f32 %v2900_v63, %v953_v46  ;;  %v1026_v58 = vadd.f32 %v2902_v2, %v954_v47  ;;  %v1094_v40 = vmax.f32 %v1030_v33, 0.0  ;;  %v701_v45 = vmul.f32 %v2882_v49, %v558_v26 }
  0x9e   : > { %1481 = vmatmul.bf16.vlgmr.msra.gmra.mxu0 %v1313_v55  ;;  %1570 = vmatmul.bf16.vlgmr.msra.gmra.mxu1 %v1314_v56  ;;  %v1091_v59 = vmax.f32 %v1027_v48, 0.0  ;;  %v1092_v60 = vmax.f32 %v1028_v51, 0.0  ;;  %v702_v46 = vmul.f32 %v2884_v50, %v558_v26 }
  0x9f   : > { %632 = vperm.xlu1 %2588, %v2891_v54   ;;  %v1089_v61 = vmax.f32 %v1025_v57, 0.0  ;;  %v1090_v62 = vmax.f32 %v1026_v58, 0.0  ;;  %v695_v54 = vmul.f32 %v2882_v49, %v543_v29 }
  0xa0   : > { %v548_v3 = vpop.permute.xlu1 %547  ;;  %v773_v4 = vpop.permute.xlu0 %772  ;;  %v1152_v7 = vpack.c.bf16 %v1092_v60, %v1091_v59  ;;  %2590 = vset.pattern.permute.xlu2 %v2694_v1 }
  0xa1   : > { %v697_v6 = vmul.f32 %v2882_v49, %v548_v3  ;;  %v698_v9 = vmul.f32 %v2884_v50, %v548_v3  ;;  %v895_v10 = vmul.f32 %v2886_v52, %v773_v4  ;;  %v896_v11 = vmul.f32 %v2888_v53, %v773_v4  ;;  %637 = vperm.xlu2 %2590, %v492_v16  }
  0xa2   : > { %v1151_v12 = vpack.c.bf16 %v1090_v62, %v1089_v61  ;;  %v1255_v17 = vunpack.c.l.b16 %v1152_v7  ;;  %v1256_v18 = vunpack.c.h.b16 %v1152_v7  ;;  %v957_v24 = vadd.f32 %v893_v14, %v695_v54 }
  0xa3   : > { %v959_v19 = vadd.f32 %v895_v10, %v697_v6  ;;  %v960_v20 = vadd.f32 %v896_v11, %v698_v9  ;;  %v563_v51 = vpop.permute.xlu2 %562  ;;  %v498_v10 = vld [vmem:[%s2789_s25 + $0xe8] sm:$0xff] }
  0xa4   : > { %v1253_v22 = vunpack.c.l.b16 %v1151_v12  ;;  %v1254_v23 = vunpack.c.h.b16 %v1151_v12  ;;  %v1029_v32 = vadd.f32 %v2900_v63, %v957_v24  ;;  %868 = vperm.xlu0 %2596, %v498_v10  }
  0xa5   : > { %v1031_v27 = vadd.f32 %v2900_v63, %v959_v19  ;;  %v1032_v28 = vadd.f32 %v2902_v2, %v960_v20 }
  0xa6   : > { %v1315_v29 = vpack.c.b16 %v1255_v17, %v1253_v22  ;;  %v1316_v30 = vpack.c.b16 %v1256_v18, %v1254_v23  ;;  %v1093_v37 = vmax.f32 %v1029_v32, 0.0  ;;  %v496_v18 = vld [vmem:[%s2789_s25 + $0xd8] sm:$0xff] }
  0xa7   : > { %2591 = vset.pattern.permute.xlu1 %v2693_v0  ;;  %v1095_v35 = vmax.f32 %v1031_v27, 0.0  ;;  %v1096_v36 = vmax.f32 %v1032_v28, 0.0  ;;  %v703_v27 = vmul.f32 %v2882_v49, %v563_v51  ;;  %v499_v28 = vld [vmem:[%s2789_s25 + $0xf0] sm:$0xff] }
  0xa8   : > { %v553_v21 = vpop.permute.xlu1 %552  ;;  %844 = vperm.xlu1 %2591, %v492_v16   ;;  %v777_v41 = vpop.permute.xlu0 %776  ;;  %v1153_v56 = vpack.c.bf16 %v1094_v40, %v1093_v37 }
  0xa9   : > { %642 = vperm.xlu2 %2590, %v493_v34   ;;  %v1154_v55 = vpack.c.bf16 %v1096_v36, %v1095_v35  ;;  %v699_v57 = vmul.f32 %v2882_v49, %v553_v21  ;;  %v700_v58 = vmul.f32 %v2884_v50, %v553_v21  ;;  %v897_v59 = vmul.f32 %v2886_v52, %v777_v41 }
  0xaa   : > { %v898_v60 = vmul.f32 %v2888_v53, %v777_v41  ;;  %v1257_v7 = vunpack.c.l.b16 %v1153_v56  ;;  %v1258_v9 = vunpack.c.h.b16 %v1153_v56 }
  0xab   : > { %v1259_v3 = vunpack.c.l.b16 %v1154_v55  ;;  %v1260_v4 = vunpack.c.h.b16 %v1154_v55  ;;  %v961_v5 = vadd.f32 %v897_v59, %v699_v57  ;;  %v789_v16 = vpop.permute.xlu2 %788 }
  0xac   : > { %v962_v6 = vadd.f32 %v898_v60, %v700_v58  ;;  %v903_v21 = vmul.f32 %v2886_v52, %v789_v16  ;;  %v904_v22 = vmul.f32 %v2888_v53, %v789_v16  ;;  %872 = vperm.xlu0 %2596, %v499_v28  }
  0xad   : > { %v1317_v54 = vpack.c.b16 %v1259_v3, %v1257_v7  ;;  %v1318_v13 = vpack.c.b16 %v1260_v4, %v1258_v9  ;;  %v1033_v14 = vadd.f32 %v2900_v63, %v961_v5 }
  0xae   : > { %1486 = vmatmul.bf16.gmra.mxu0 %v1315_v29  ;;  %1575 = vmatmul.bf16.gmra.mxu1 %v1316_v30  ;;  %v1034_v15 = vadd.f32 %v2902_v2, %v962_v6  ;;  %v704_v29 = vmul.f32 %v2884_v50, %v563_v51 }
  0xaf   : > { %v1097_v23 = vmax.f32 %v1033_v14, 0.0 }
  0xb0   : > { %848 = vperm.xlu1 %2591, %v493_v34   ;;  %v1098_v24 = vmax.f32 %v1034_v15, 0.0 }
  0xb1   : > { %v781_v39 = vpop.permute.xlu1 %780  ;;  %2593 = vset.pattern.permute.xlu2 %v2693_v0  ;;  %v568_v17 = vpop.permute.xlu0 %567 }
  0xb2   : > { %v899_v47 = vmul.f32 %v2886_v52, %v781_v39  ;;  %v900_v48 = vmul.f32 %v2888_v53, %v781_v39  ;;  %852 = vperm.xlu2 %2593, %v494_v8   ;;  %v705_v25 = vmul.f32 %v2882_v49, %v568_v17  ;;  %v706_v26 = vmul.f32 %v2884_v50, %v568_v17 }
  0xb3   : > { %v1155_v35 = vpack.c.bf16 %v1098_v24, %v1097_v23  ;;  %v578_v56 = vpop.permute.xlu2 %577  ;;  %v500_v24 = vld [vmem:[%s2789_s25 + $0xf8] sm:$0xff] }
  0xb4   : > { %v963_v61 = vadd.f32 %v899_v47, %v701_v45  ;;  %v964_v62 = vadd.f32 %v900_v48, %v702_v46  ;;  %v967_v33 = vadd.f32 %v903_v21, %v705_v25  ;;  %v968_v34 = vadd.f32 %v904_v22, %v706_v26 }
  0xb5   : > { %v1261_v47 = vunpack.c.l.b16 %v1155_v35  ;;  %v1262_v48 = vunpack.c.h.b16 %v1155_v35  ;;  %v709_v4 = vmul.f32 %v2882_v49, %v578_v56 }
  0xb6   : > { %v1035_v11 = vadd.f32 %v2900_v63, %v963_v61  ;;  %v1036_v12 = vadd.f32 %v2902_v2, %v964_v62  ;;  %v1039_v45 = vadd.f32 %v2900_v63, %v967_v33  ;;  %v1040_v46 = vadd.f32 %v2902_v2, %v968_v34  ;;  %v497_v61 = vld [vmem:[%s2789_s25 + $0xe0] sm:$0xff]  ;;  %s2504_s25 = sshll.u32 %s2778_s18, 6  ;;  %s427_s18 = sand.u32 1, %s2683_s30  }
  0xb7   : > { %s3010_s21 = scalar_lea.vmem %s3300_s5, %s2504_s25  ;;  %s3168_s27 = scalar_lea.vmem %s3302_s7, %s2504_s25 }
  0xb8   : > { %2594 = vset.pattern.permute.xlu1 %v2694_v1  ;;  %v1099_v19 = vmax.f32 %v1035_v11, 0.0  ;;  %v1100_v20 = vmax.f32 %v1036_v12, 0.0  ;;  %v1103_v59 = vmax.f32 %v1039_v45, 0.0  ;;  %v1104_v60 = vmax.f32 %v1040_v46, 0.0  ;;  %s2497_s30 = sshll.u32 (%p2770_p4), %s2758_s12, 2 }
  0xb9   : > { %652 = vperm.xlu1 %2594, %v495_v31   ;;  %v785_v8 = vpop.permute.xlu1 %784 }
  0xba   : > { %2595 = vset.pattern.permute.xlu2 %v2694_v1  ;;  %v901_v30 = vmul.f32 %v2886_v52, %v785_v8  ;;  %v902_v31 = vmul.f32 %v2888_v53, %v785_v8  ;;  %v1156_v32 = vpack.c.bf16 %v1100_v20, %v1099_v19  ;;  %v793_v5 = vpop.permute.xlu0 %792  ;;  %v1158_v6 = vpack.c.bf16 %v1104_v60, %v1103_v59 }
  0xbb   : > { %657 = vperm.xlu2 %2595, %v496_v18   ;;  %v905_v11 = vmul.f32 %v2886_v52, %v793_v5  ;;  %v906_v12 = vmul.f32 %v2888_v53, %v793_v5  ;;  %v583_v16 = vpop.permute.xlu2 %582 }
  0xbc   : > { %v965_v36 = vadd.f32 %v901_v30, %v703_v27  ;;  %v966_v37 = vadd.f32 %v902_v31, %v704_v29  ;;  %v1263_v40 = vunpack.c.l.b16 %v1156_v32  ;;  %v1264_v39 = vunpack.c.h.b16 %v1156_v32 }
  0xbd   : > { %v1268_v19 = vunpack.c.h.b16 %v1158_v6 }
  0xbe   : > { %1491 = vmatmul.bf16.gmra.mxu0 %v1317_v54  ;;  %1580 = vmatmul.bf16.gmra.mxu1 %v1318_v13  ;;  %v1037_v51 = vadd.f32 %v2900_v63, %v965_v36  ;;  %v1038_v55 = vadd.f32 %v2902_v2, %v966_v37  ;;  %v1319_v57 = vpack.c.b16 %v1263_v40, %v1261_v47 }
  0xbf   : > { %v1320_v58 = vpack.c.b16 %v1264_v39, %v1262_v48  ;;  %v710_v54 = vmul.f32 %v2884_v50, %v578_v56  ;;  %v712_v37 = vmul.f32 %v2884_v50, %v583_v16 }
  0xc0   : > { %v1101_v62 = vmax.f32 %v1037_v51, 0.0  ;;  %v1102_v3 = vmax.f32 %v1038_v55, 0.0  ;;  %v2529_v55 = vld [vmem:[%s3010_s21 + $0x38] sm:$0xff] }
  0xc1   : > { %2597 = vset.pattern.permute.xlu1 %v2693_v0  ;;  %1767 = vmatpush.bf16.msra.mxu2 %v2529_v55 }
  0xc2   : > { %860 = vperm.xlu1 %2597, %v496_v18   ;;  %v573_v41 = vpop.permute.xlu1 %572  ;;  %v1157_v15 = vpack.c.bf16 %v1102_v3, %v1101_v62  ;;  %v1267_v18 = vunpack.c.l.b16 %v1158_v6  ;;  %v805_v40 = vpop.permute.xlu0 %804 }
  0xc3   : > { %662 = vperm.xlu2 %2595, %v497_v61   ;;  %v707_v7 = vmul.f32 %v2882_v49, %v573_v41  ;;  %v708_v9 = vmul.f32 %v2884_v50, %v573_v41  ;;  %v801_v36 = vpop.permute.xlu2 %800  ;;  %v911_v39 = vmul.f32 %v2886_v52, %v805_v40  ;;  %v912_v48 = vmul.f32 %v2888_v53, %v805_v40 }
  0xc4   : > { %v1265_v22 = vunpack.c.l.b16 %v1157_v15  ;;  %v1266_v23 = vunpack.c.h.b16 %v1157_v15  ;;  %v909_v41 = vmul.f32 %v2886_v52, %v801_v36  ;;  %v910_v45 = vmul.f32 %v2888_v53, %v801_v36 }
  0xc5   : > { %v969_v8 = vadd.f32 %v905_v11, %v707_v7  ;;  %v970_v17 = vadd.f32 %v906_v12, %v708_v9  ;;  %v514_v40 = vsel %vm513_vm3, %v2864_v38, %v504_v42 }
  0xc6   : > { %v1321_v29 = vpack.c.b16 %v1267_v18, %v1265_v22  ;;  %v1322_v30 = vpack.c.b16 %v1268_v19, %v1266_v23 }
  0xc7   : > { %v1041_v25 = vadd.f32 %v2900_v63, %v969_v8  ;;  %v1042_v26 = vadd.f32 %v2902_v2, %v970_v17  ;;  %v2527_v8 = vld [vmem:[%s3010_s21 + $0x28] sm:$0xff] }
  0xc9   : > { %v1105_v32 = vmax.f32 %v1041_v25, 0.0  ;;  %v1106_v33 = vmax.f32 %v1042_v26, 0.0  ;;  %v2526_v26 = vld [vmem:[%s3010_s21 + $0x20] sm:$0xff] }
  0xca   : > { %2598 = vset.pattern.permute.xlu1 %v2694_v1  ;;  %v809_v18 = vpop.permute.xlu0 %808 }
  0xcb   : > { %667 = vperm.xlu1 %2598, %v498_v10   ;;  %v797_v10 = vpop.permute.xlu1 %796  ;;  %2599 = vset.pattern.permute.xlu2 %v2693_v0  ;;  %v1159_v46 = vpack.c.bf16 %v1106_v33, %v1105_v32 }
  0xcc   : > { %v907_v13 = vmul.f32 %v2886_v52, %v797_v10  ;;  %v908_v14 = vmul.f32 %v2888_v53, %v797_v10  ;;  %864 = vperm.xlu2 %2599, %v497_v61   ;;  %v598_v10 = vpop.permute.xlu2 %597 }
  0xcd   : > { %v1269_v59 = vunpack.c.l.b16 %v1159_v46  ;;  %v1270_v60 = vunpack.c.h.b16 %v1159_v46  ;;  %v717_v19 = vmul.f32 %v2882_v49, %v598_v10 }
  0xce   : > { %1496 = vmatmul.bf16.gmra.mxu0 %v1319_v57  ;;  %1585 = vmatmul.bf16.gmra.mxu1 %v1320_v58  ;;  %v971_v20 = vadd.f32 %v907_v13, %v709_v4  ;;  %v972_v21 = vadd.f32 %v908_v14, %v710_v54  ;;  %v974_v57 = vadd.f32 %v910_v45, %v712_v37  ;;  %v2528_v54 = vld [vmem:[%s3010_s21 + $0x30] sm:$0xff] }
  0xcf   : > { %1768 = vmatpush.bf16.msra.mxu2 %v2528_v54 }
  0xd0   : > { %v1043_v27 = vadd.f32 %v2900_v63, %v971_v20  ;;  %v1046_v6 = vadd.f32 %v2902_v2, %v974_v57  ;;  %v2524_v57 = vld [vmem:[%s3010_s21 + $0x10] sm:$0xff] }
  0xd2   : > { %v1107_v34 = vmax.f32 %v1043_v27, 0.0  ;;  %v1110_v14 = vmax.f32 %v1046_v6, 0.0 }
  0xd3   : > { %672 = vperm.xlu1 %2598, %v499_v28   ;;  %v1044_v28 = vadd.f32 %v2902_v2, %v972_v21  ;;  %v718_v21 = vmul.f32 %v2884_v50, %v598_v10  ;;  %1769 = vmatpush.bf16.msra.mxu2 %v2527_v8  ;;  %v608_v38 = vpop.permute.xlu0 %607 }
  0xd4   : > { %v588_v31 = vpop.permute.xlu1 %587  ;;  %2600 = vset.pattern.permute.xlu2 %v2694_v1 }
  0xd5   : > { %v1108_v35 = vmax.f32 %v1044_v28, 0.0  ;;  %677 = vperm.xlu2 %2600, %v500_v24   ;;  %v713_v1 = vmul.f32 %v2882_v49, %v588_v31  ;;  %v714_v47 = vmul.f32 %v2884_v50, %v588_v31 }
  0xd7   : > { %v1160_v51 = vpack.c.bf16 %v1108_v35, %v1107_v34  ;;  %v975_v61 = vadd.f32 %v911_v39, %v713_v1  ;;  %v976_v62 = vadd.f32 %v912_v48, %v714_v47  ;;  %1770 = vmatpush.bf16.msra.mxu2 %v2526_v26  ;;  %v516_v39 = vsel %vm515_vm4, %v505_v43, %v506_v44  ;;  %v2525_v47 = vld [vmem:[%s3010_s21 + $0x18] sm:$0xff] }
  0xd8   : > { %v518_v55 = vsel %vm517_vm5, %v514_v40, %v516_v39 }
  0xd9   : > { %v1271_v3 = vunpack.c.l.b16 %v1160_v51  ;;  %v1272_v4 = vunpack.c.h.b16 %v1160_v51  ;;  %v1047_v7 = vadd.f32 %v2900_v63, %v975_v61  ;;  %v1048_v9 = vadd.f32 %v2902_v2, %v976_v62 }
  0xda   : > { %v722_v62 = vmul.f32 %v2884_v50, %v608_v38 }
  0xdb   : > { %2601 = vset.pattern.permute.xlu1 %v2693_v0  ;;  %v711_v0 = vmul.f32 %v2882_v49, %v583_v16  ;;  %v1323_v11 = vpack.c.b16 %v1271_v3, %v1269_v59  ;;  %v1324_v12 = vpack.c.b16 %v1272_v4, %v1270_v60  ;;  %v1111_v15 = vmax.f32 %v1047_v7, 0.0  ;;  %1771 = vmatpush.bf16.msra.mxu2 %v2525_v47 }
  0xdc   : > { %876 = vperm.xlu1 %2601, %v500_v24   ;;  %v593_v58 = vpop.permute.xlu1 %592  ;;  %v1112_v16 = vmax.f32 %v1048_v9, 0.0  ;;  %v603_v24 = vpop.permute.xlu2 %602  ;;  %v2523_v9 = vld [vmem:[%s3010_s21 + $0x8] sm:$0xff] }
  0xdd   : > { %v973_v56 = vadd.f32 %v909_v41, %v711_v0  ;;  %v715_v27 = vmul.f32 %v2882_v49, %v593_v58  ;;  %v716_v28 = vmul.f32 %v2884_v50, %v593_v58  ;;  %v519_v58 = vrot.slane %v518_v55, 1 }
  0xde   : > { %1501 = vmatmul.bf16.gmra.mxu0 %v1321_v29  ;;  %1590 = vmatmul.bf16.gmra.mxu1 %v1322_v30  ;;  %v1162_v25 = vpack.c.bf16 %v1112_v16, %v1111_v15  ;;  %v913_v29 = vmul.f32 %v2886_v52, %v809_v18  ;;  %v914_v30 = vmul.f32 %v2888_v53, %v809_v18 }
  0xdf   : > { %v1045_v5 = vadd.f32 %v2900_v63, %v973_v56  ;;  %v719_v3 = vmul.f32 %v2882_v49, %v603_v24  ;;  %1772 = vmatpush.bf16.msra.mxu2 %v2524_v57  ;;  %v720_v4 = vmul.f32 %v2884_v50, %v603_v24  ;;  %v3053_v10 = vperm.slane %v519_v58, 0 }
  0xe0   : > { %v1275_v35 = vunpack.c.l.b16 %v1162_v25  ;;  %v1276_v36 = vunpack.c.h.b16 %v1162_v25  ;;  %v977_v0 = vadd.f32 %v913_v29, %v715_v27  ;;  %v978_v37 = vadd.f32 %v914_v30, %v716_v28 }
  0xe1   : > { %v1109_v13 = vmax.f32 %v1045_v5, 0.0 }
  0xe2   : > { %v1049_v48 = vadd.f32 %v2900_v63, %v977_v0  ;;  %v1050_v51 = vadd.f32 %v2902_v2, %v978_v37 }
  0xe3   : > { %v1161_v20 = vpack.c.bf16 %v1110_v14, %v1109_v13  ;;  %1773 = vmatpush.bf16.msra.mxu2 %v2523_v9 }
  0xe4   : > { %v821_v42 = vpop.permute.xlu2 %820  ;;  %v1113_v61 = vmax.f32 %v1049_v48, 0.0 }
  0xe5   : > { %v813_v17 = vpop.permute.xlu1 %812  ;;  %v1273_v31 = vunpack.c.l.b16 %v1161_v20  ;;  %v1274_v32 = vunpack.c.h.b16 %v1161_v20  ;;  %v919_v59 = vmul.f32 %v2886_v52, %v821_v42  ;;  %v920_v60 = vmul.f32 %v2888_v53, %v821_v42 }
  0xe6   : > { %v915_v22 = vmul.f32 %v2886_v52, %v813_v17  ;;  %v916_v23 = vmul.f32 %v2888_v53, %v813_v17  ;;  %v2522_v17 = vld [vmem:[%s3010_s21] sm:$0xff]  ;;  %s2167_s21 = scalar_lea.vmem (%p2770_p4), %s3304_s9, %s2497_s30 }
  0xe7   : > { %v1325_v46 = vpack.c.b16 %v1275_v35, %v1273_v31  ;;  %v1326_v1 = vpack.c.b16 %v1276_v36, %v1274_v32  ;;  %v984_v54 = vadd.f32 %v920_v60, %v722_v62  ;;  %1774 = vmatpush.bf16.msra.mxu2 %v2522_v17  ;;  %v3077_v60 = vld [vmem:[%s452_s22] ss:$0 sm:$0xff] }
  0xe8   : > { %v979_v33 = vadd.f32 %v915_v22, %v717_v19  ;;  %v980_v34 = vadd.f32 %v916_v23, %v718_v21 }
  0xea   : > { %v1051_v41 = vadd.f32 %v2900_v63, %v979_v33  ;;  %v1052_v45 = vadd.f32 %v2902_v2, %v980_v34  ;;  %v1114_v63 = vmax.f32 %v1050_v51, 0.0  ;;  %v721_v2 = vmul.f32 %v2882_v49, %v608_v38  ;;  %v825_v33 = vpop.permute.xlu0 %824 }
  0xeb   : > { %v921_v37 = vmul.f32 %v2886_v52, %v825_v33  ;;  %v922_v40 = vmul.f32 %v2888_v53, %v825_v33 }
  0xec   : > { %v1115_v43 = vmax.f32 %v1051_v41, 0.0  ;;  %v1116_v44 = vmax.f32 %v1052_v45, 0.0  ;;  %v1163_v13 = vpack.c.bf16 %v1114_v63, %v1113_v61  ;;  %v618_v25 = vpop.permute.xlu2 %617 }
  0xed   : > { %v817_v56 = vpop.permute.xlu1 %816  ;;  %v725_v32 = vmul.f32 %v2882_v49, %v618_v25  ;;  %v726_v39 = vmul.f32 %v2884_v50, %v618_v25 }
  0xee   : > { %1506 = vmatmul.bf16.gmra.mxu0 %v1323_v11  ;;  %1595 = vmatmul.bf16.gmra.mxu1 %v1324_v12  ;;  %v917_v5 = vmul.f32 %v2886_v52, %v817_v56  ;;  %v918_v6 = vmul.f32 %v2888_v53, %v817_v56  ;;  %v1164_v7 = vpack.c.bf16 %v1116_v44, %v1115_v43  ;;  %v3055_v11 = vperm.slane %v519_v58, 1 }
  0xef   : > { %v983_v12 = vadd.f32 %v919_v59, %v721_v2  ;;  %v1277_v21 = vunpack.c.l.b16 %v1163_v13  ;;  %v1278_v22 = vunpack.c.h.b16 %v1163_v13 }
  0xf0   : > { %v981_v14 = vadd.f32 %v917_v5, %v719_v3  ;;  %v982_v15 = vadd.f32 %v918_v6, %v720_v4  ;;  %v1279_v16 = vunpack.c.l.b16 %v1164_v7  ;;  %v1280_v8 = vunpack.c.h.b16 %v1164_v7 }
  0xf1   : > { %v1055_v19 = vadd.f32 %v3053_v10, %v983_v12  ;;  %v1056_v20 = vadd.f32 %v3055_v11, %v984_v54 }
  0xf2   : > { %v1053_v23 = vadd.f32 %v3053_v10, %v981_v14  ;;  %v1054_v24 = vadd.f32 %v3055_v11, %v982_v15  ;;  %v1327_v26 = vpack.c.b16 %v1279_v16, %v1277_v21  ;;  %v1328_v27 = vpack.c.b16 %v1280_v8, %v1278_v22  ;;  %v837_v13 = vpop.permute.xlu0 %836 }
  0xf3   : > { %v1119_v28 = vmax.f32 %v1055_v19, 0.0  ;;  %v1120_v29 = vmax.f32 %v1056_v20, 0.0  ;;  %v927_v8 = vmul.f32 %v2886_v52, %v837_v13  ;;  %v928_v19 = vmul.f32 %v2888_v53, %v837_v13 }
  0xf4   : > { %v1117_v30 = vmax.f32 %v1053_v23, 0.0  ;;  %v1118_v31 = vmax.f32 %v1054_v24, 0.0 }
  0xf5   : > { %v1166_v34 = vpack.c.bf16 %v1120_v29, %v1119_v28 }
  0xf6   : > { %v613_v18 = vpop.permute.xlu1 %612 }
  0xf7   : > { %v723_v35 = vmul.f32 %v2882_v49, %v613_v18  ;;  %v724_v36 = vmul.f32 %v2884_v50, %v613_v18  ;;  %v1283_v51 = vunpack.c.l.b16 %v1166_v34  ;;  %v1284_v55 = vunpack.c.h.b16 %v1166_v34 }
  0xf9   : > { %v985_v47 = vadd.f32 %v921_v37, %v723_v35  ;;  %v986_v48 = vadd.f32 %v922_v40, %v724_v36 }
  0xfb   : > { %v1057_v44 = vadd.f32 %v3053_v10, %v985_v47  ;;  %v1058_v57 = vadd.f32 %v3055_v11, %v986_v48 }
  0xfd   : > { %v1121_v4 = vmax.f32 %v1057_v44, 0.0  ;;  %v1122_v5 = vmax.f32 %v1058_v57, 0.0 }
  0xfe   : > { %1511 = vmatmul.bf16.gmra.mxu0 %v1325_v46  ;;  %1600 = vmatmul.bf16.gmra.mxu1 %v1326_v1  ;;  %v1165_v46 = vpack.c.bf16 %v1118_v31, %v1117_v30  ;;  %v623_v1 = vpop.permute.xlu2 %622 }
  0xff   : > { %v829_v0 = vpop.permute.xlu1 %828  ;;  %v727_v54 = vmul.f32 %v2882_v49, %v623_v1  ;;  %v728_v14 = vmul.f32 %v2884_v50, %v623_v1  ;;  %v1167_v22 = vpack.c.bf16 %v1122_v5, %v1121_v4 }
 0x100   : > { %v923_v41 = vmul.f32 %v2886_v52, %v829_v0  ;;  %v924_v45 = vmul.f32 %v2888_v53, %v829_v0  ;;  %v1281_v38 = vunpack.c.l.b16 %v1165_v46  ;;  %v1282_v43 = vunpack.c.h.b16 %v1165_v46 }
 0x101   : > { %v1286_v33 = vunpack.c.h.b16 %v1167_v22 }
 0x102   : > { %v987_v42 = vadd.f32 %v923_v41, %v725_v32  ;;  %v988_v56 = vadd.f32 %v924_v45, %v726_v39  ;;  %v1329_v2 = vpack.c.b16 %v1283_v51, %v1281_v38  ;;  %v1330_v62 = vpack.c.b16 %v1284_v55, %v1282_v43  ;;  %v841_v43 = vpop.permute.xlu0 %840 }
 0x103   : > { %v1285_v32 = vunpack.c.l.b16 %v1167_v22  ;;  %v930_v4 = vmul.f32 %v2888_v53, %v841_v43 }
 0x104   : > { %v1059_v61 = vadd.f32 %v3053_v10, %v987_v42  ;;  %v1060_v63 = vadd.f32 %v3055_v11, %v988_v56 }
 0x106   : > { %v1123_v6 = vmax.f32 %v1059_v61, 0.0  ;;  %v1124_v7 = vmax.f32 %v1060_v63, 0.0  ;;  %v833_v9 = vpop.permute.xlu2 %832  ;;  %v929_v61 = vmul.f32 %v2886_v52, %v841_v43 }
 0x107   : > { %v925_v15 = vmul.f32 %v2886_v52, %v833_v9  ;;  %v926_v16 = vmul.f32 %v2888_v53, %v833_v9 }
 0x108   : > { %v628_v3 = vpop.permute.xlu1 %627  ;;  %v1168_v25 = vpack.c.bf16 %v1124_v7, %v1123_v6 }
 0x109   : > { %v729_v17 = vmul.f32 %v2882_v49, %v628_v3  ;;  %v730_v18 = vmul.f32 %v2884_v50, %v628_v3 }
 0x10a   : > { %v1287_v36 = vunpack.c.l.b16 %v1168_v25  ;;  %v1288_v0 = vunpack.c.h.b16 %v1168_v25 }
 0x10b   : > { %v991_v30 = vadd.f32 %v927_v8, %v729_v17  ;;  %v992_v31 = vadd.f32 %v928_v19, %v730_v18 }
 0x10c   : > { %v1331_v48 = vpack.c.b16 %v1287_v36, %v1285_v32  ;;  %v1332_v51 = vpack.c.b16 %v1288_v0, %v1286_v33 }
 0x10d   : > { %v1063_v45 = vadd.f32 %v3053_v10, %v991_v30  ;;  %v1064_v46 = vadd.f32 %v3055_v11, %v992_v31 }
 0x10e   : > { %1516 = vmatmul.bf16.gmra.mxu0 %v1327_v26  ;;  %1605 = vmatmul.bf16.gmra.mxu1 %v1328_v27  ;;  %v989_v26 = vadd.f32 %v925_v15, %v727_v54  ;;  %v990_v27 = vadd.f32 %v926_v16, %v728_v14  ;;  %v638_v39 = vpop.permute.xlu2 %637 }
 0x10f   : > { %v1127_v56 = vmax.f32 %v1063_v45, 0.0  ;;  %v1128_v38 = vmax.f32 %v1064_v46, 0.0 }
 0x110   : > { %v1061_v37 = vadd.f32 %v3053_v10, %v989_v26  ;;  %v1062_v40 = vadd.f32 %v3055_v11, %v990_v27 }
 0x111   : > { %v633_v29 = vpop.permute.xlu1 %632  ;;  %v1170_v7 = vpack.c.bf16 %v1128_v38, %v1127_v56 }
 0x112   : > { %v1125_v55 = vmax.f32 %v1061_v37, 0.0  ;;  %v1126_v42 = vmax.f32 %v1062_v40, 0.0  ;;  %v732_v3 = vmul.f32 %v2884_v50, %v633_v29 }
 0x113   : > { %v1291_v18 = vunpack.c.l.b16 %v1170_v7  ;;  %v1292_v19 = vunpack.c.h.b16 %v1170_v7 }
 0x114   : > { %v994_v17 = vadd.f32 %v930_v4, %v732_v3 }
 0x116   : > { %v643_v63 = vpop.permute.xlu2 %642  ;;  %v1066_v26 = vadd.f32 %v3055_v11, %v994_v17 }
 0x117   : > { %v736_v45 = vmul.f32 %v2884_v50, %v643_v63 }
 0x118   : > { %v1130_v0 = vmax.f32 %v1066_v26, 0.0 }
 0x11a   : > { %v845_v57 = vpop.permute.xlu1 %844 }
 0x11b   : > { %v1482_v58 = vpop.f32.mrf.mxu0  ;;  %v1571_v59 = vpop.f32.mrf.mxu1  ;;  %v931_v9 = vmul.f32 %v2886_v52, %v845_v57 }
 0x11c   : > { %v1483_v12 = vadd.f32 %v3077_v60, %v1482_v58  ;;  %v733_v58 = vmul.f32 %v2882_v49, %v638_v39 }
 0x11e   : > { %1521 = vmatmul.bf16.gmra.mxu0 %v1329_v2  ;;  %1610 = vmatmul.bf16.gmra.mxu1 %v1330_v62  ;;  %v1572_v23 = vadd.f32 %v1571_v59, %v1483_v12  ;;  %v734_v59 = vmul.f32 %v2884_v50, %v638_v39  ;;  %v1169_v2 = vpack.c.bf16 %v1126_v42, %v1125_v55  ;;  %v853_v33 = vpop.permute.xlu2 %852 }
 0x11f   : > { %v731_v62 = vmul.f32 %v2882_v49, %v633_v29  ;;  %v932_v12 = vmul.f32 %v2888_v53, %v845_v57  ;;  %v935_v46 = vmul.f32 %v2886_v52, %v853_v33 }
 0x120   : > { %v1651_v34 = vmax.f32 %v1572_v23, 0.0  ;;  %v1289_v15 = vunpack.c.l.b16 %v1169_v2  ;;  %v1290_v16 = vunpack.c.h.b16 %v1169_v2 }
 0x121   : > { %v993_v8 = vadd.f32 %v929_v61, %v731_v62 }
 0x122   : > { %v1333_v31 = vpack.c.b16 %v1291_v18, %v1289_v15  ;;  %v1334_v32 = vpack.c.b16 %v1292_v19, %v1290_v16 }
 0x123   : > { %v1484_v20 = vpop.f32.mrf.mxu0  ;;  %v1573_v21 = vpop.f32.mrf.mxu1  ;;  %v1065_v25 = vadd.f32 %v3053_v10, %v993_v8 }
 0x124   : > { %v1485_v24 = vadd.f32 %v3077_v60, %v1484_v20  ;;  %v995_v20 = vadd.f32 %v931_v9, %v733_v58 }
 0x125   : > { %v1129_v36 = vmax.f32 %v1065_v25, 0.0 }
 0x126   : > { %v1574_v28 = vadd.f32 %v1573_v21, %v1485_v24  ;;  %v996_v21 = vadd.f32 %v932_v12, %v734_v59  ;;  %v1067_v29 = vadd.f32 %v3053_v10, %v995_v20  ;;  %v658_v19 = vpop.permute.xlu2 %657 }
 0x127   : > { %v1171_v38 = vpack.c.bf16 %v1130_v0, %v1129_v36  ;;  %v741_v25 = vmul.f32 %v2882_v49, %v658_v19  ;;  %v742_v26 = vmul.f32 %v2884_v50, %v658_v19 }
 0x128   : > { %v1652_v35 = vmax.f32 %v1574_v28, 0.0  ;;  %v1068_v30 = vadd.f32 %v3055_v11, %v996_v21  ;;  %v1131_v37 = vmax.f32 %v1067_v29, 0.0 }
 0x129   : > { %v1293_v62 = vunpack.c.l.b16 %v1171_v38  ;;  %v1294_v3 = vunpack.c.h.b16 %v1171_v38 }
 0x12a   : > { %v1683_v41 = vpack.c.bf16 %v1652_v35, %v1651_v34  ;;  %v849_v34 = vpop.permute.xlu1 %848  ;;  %v648_v35 = vpop.permute.xlu0 %647  ;;  %v1132_v40 = vmax.f32 %v1068_v30, 0.0 }
 0x12b   : > { %v1487_v1 = vpop.f32.mrf.mxu0  ;;  %v1576_v47 = vpop.f32.mrf.mxu1  ;;  %v738_v55 = vmul.f32 %v2884_v50, %v648_v35 }
 0x12c   : > { %1775 = vmatmul.bf16.vlgmr.msra.gmra.mxu2 %v1683_v41  ;;  %v1488_v44 = vadd.f32 %v3077_v60, %v1487_v1  ;;  %v735_v41 = vmul.f32 %v2882_v49, %v643_v63  ;;  %v737_v1 = vmul.f32 %v2882_v49, %v648_v35  ;;  %v1172_v57 = vpack.c.bf16 %v1132_v40, %v1131_v37 }
 0x12e   : > { %1526 = vmatmul.bf16.gmra.mxu0 %v1331_v48  ;;  %1615 = vmatmul.bf16.gmra.mxu1 %v1332_v51  ;;  %v1577_v54 = vadd.f32 %v1576_v47, %v1488_v44  ;;  %v933_v47 = vmul.f32 %v2886_v52, %v849_v34  ;;  %v934_v48 = vmul.f32 %v2888_v53, %v849_v34  ;;  %v1295_v7 = vunpack.c.l.b16 %v1172_v57 }
 0x12f   : > { %v936_v51 = vmul.f32 %v2888_v53, %v853_v33  ;;  %v999_v58 = vadd.f32 %v935_v46, %v737_v1  ;;  %v1296_v9 = vunpack.c.h.b16 %v1172_v57  ;;  %v663_v1 = vpop.permute.xlu2 %662 }
 0x130   : > { %v1653_v22 = vmax.f32 %v1577_v54, 0.0  ;;  %v997_v59 = vadd.f32 %v933_v47, %v735_v41  ;;  %v998_v61 = vadd.f32 %v934_v48, %v736_v45  ;;  %v1335_v17 = vpack.c.b16 %v1295_v7, %v1293_v62 }
 0x131   : > { %v1000_v63 = vadd.f32 %v936_v51, %v738_v55  ;;  %v1071_v12 = vadd.f32 %v3053_v10, %v999_v58  ;;  %v1336_v18 = vpack.c.b16 %v1296_v9, %v1294_v3 }
 0x132   : > { %v1069_v54 = vadd.f32 %v3053_v10, %v997_v59 }
 0x133   : > { %v1489_v5 = vpop.f32.mrf.mxu0  ;;  %v1578_v6 = vpop.f32.mrf.mxu1 }
 0x134   : > { %v1490_v13 = vadd.f32 %v3077_v60, %v1489_v5  ;;  %v653_v5 = vpop.permute.xlu1 %652  ;;  %v1133_v20 = vmax.f32 %v1069_v54, 0.0  ;;  %v743_v54 = vmul.f32 %v2882_v49, %v663_v1 }
 0x136   : > { %v1579_v14 = vadd.f32 %v1578_v6, %v1490_v13  ;;  %v1070_v13 = vadd.f32 %v3055_v11, %v998_v61 }
 0x138   : > { %v1654_v23 = vmax.f32 %v1579_v14, 0.0  ;;  %v1072_v14 = vadd.f32 %v3055_v11, %v1000_v63  ;;  %v1134_v21 = vmax.f32 %v1070_v13, 0.0  ;;  %v865_v13 = vpop.permute.xlu2 %864 }
 0x13a   : > { %v1684_v24 = vpack.c.bf16 %v1654_v23, %v1653_v22  ;;  %v1135_v22 = vmax.f32 %v1071_v12, 0.0  ;;  %v1136_v23 = vmax.f32 %v1072_v14, 0.0  ;;  %v1173_v29 = vpack.c.bf16 %v1134_v21, %v1133_v20 }
 0x13b   : > { %v1492_v27 = vpop.f32.mrf.mxu0  ;;  %v1581_v28 = vpop.f32.mrf.mxu1 }
 0x13c   : > { %1780 = vmatmul.bf16.gmra.mxu2 %v1684_v24  ;;  %v1493_v39 = vadd.f32 %v3077_v60, %v1492_v27  ;;  %v861_v27 = vpop.permute.xlu1 %860  ;;  %v1174_v30 = vpack.c.bf16 %v1136_v23, %v1135_v22  ;;  %v1297_v51 = vunpack.c.l.b16 %v1173_v29  ;;  %v1298_v55 = vunpack.c.h.b16 %v1173_v29 }
 0x13d   : > { %v939_v0 = vmul.f32 %v2886_v52, %v861_v27  ;;  %v940_v37 = vmul.f32 %v2888_v53, %v861_v27 }
 0x13e   : > { %1531 = vmatmul.bf16.gmra.mxu0 %v1333_v31  ;;  %1620 = vmatmul.bf16.gmra.mxu1 %v1334_v32  ;;  %v1582_v43 = vadd.f32 %v1581_v28, %v1493_v39  ;;  %v857_v28 = vpop.permute.xlu0 %856  ;;  %v739_v31 = vmul.f32 %v2882_v49, %v653_v5  ;;  %v740_v32 = vmul.f32 %v2884_v50, %v653_v5  ;;  %v1299_v45 = vunpack.c.l.b16 %v1174_v30 }
 0x13f   : > { %v937_v33 = vmul.f32 %v2886_v52, %v857_v28  ;;  %v938_v34 = vmul.f32 %v2888_v53, %v857_v28  ;;  %v1300_v46 = vunpack.c.h.b16 %v1174_v30 }
 0x140   : > { %v1655_v4 = vmax.f32 %v1582_v43, 0.0  ;;  %v1337_v62 = vpack.c.b16 %v1299_v45, %v1297_v51 }
 0x141   : > { %v1001_v47 = vadd.f32 %v937_v33, %v739_v31  ;;  %v1002_v48 = vadd.f32 %v938_v34, %v740_v32  ;;  %v1338_v3 = vpack.c.b16 %v1300_v46, %v1298_v55 }
 0x143   : > { %v1494_v42 = vpop.f32.mrf.mxu0  ;;  %v1583_v56 = vpop.f32.mrf.mxu1  ;;  %v1073_v57 = vadd.f32 %v3053_v10, %v1001_v47  ;;  %v1074_v58 = vadd.f32 %v3055_v11, %v1002_v48 }
 0x144   : > { %v1495_v44 = vadd.f32 %v3077_v60, %v1494_v42  ;;  %v1003_v42 = vadd.f32 %v939_v0, %v741_v25 }
 0x145   : > { %v1137_v5 = vmax.f32 %v1073_v57, 0.0 }
 0x146   : > { %v1584_v2 = vadd.f32 %v1583_v56, %v1495_v44  ;;  %v1004_v56 = vadd.f32 %v940_v37, %v742_v26  ;;  %v1075_v63 = vadd.f32 %v3053_v10, %v1003_v42  ;;  %v869_v14 = vpop.permute.xlu0 %868 }
 0x147   : > { %v944_v20 = vmul.f32 %v2888_v53, %v869_v14 }
 0x148   : > { %v1656_v6 = vmax.f32 %v1584_v2, 0.0  ;;  %v1076_v2 = vadd.f32 %v3055_v11, %v1004_v56  ;;  %v1139_v7 = vmax.f32 %v1075_v63, 0.0 }
 0x14a   : > { %v1685_v15 = vpack.c.bf16 %v1656_v6, %v1655_v4  ;;  %v668_v4 = vpop.permute.xlu1 %667  ;;  %v1138_v6 = vmax.f32 %v1074_v58, 0.0  ;;  %v1140_v9 = vmax.f32 %v1076_v2, 0.0 }
 0x14b   : > { %v1497_v16 = vpop.f32.mrf.mxu0  ;;  %v1586_v8 = vpop.f32.mrf.mxu1  ;;  %v746_v19 = vmul.f32 %v2884_v50, %v668_v4 }
 0x14c   : > { %1785 = vmatmul.bf16.gmra.mxu2 %v1685_v15  ;;  %v1498_v24 = vadd.f32 %v3077_v60, %v1497_v16  ;;  %v744_v15 = vmul.f32 %v2884_v50, %v663_v1  ;;  %v941_v16 = vmul.f32 %v2886_v52, %v865_v13  ;;  %v1175_v23 = vpack.c.bf16 %v1138_v6, %v1137_v5 }
 0x14d   : > { %v1176_v26 = vpack.c.bf16 %v1140_v9, %v1139_v7  ;;  %v1008_v32 = vadd.f32 %v944_v20, %v746_v19 }
 0x14e   : > { %1536 = vmatmul.bf16.gmra.mxu0 %v1335_v17  ;;  %1625 = vmatmul.bf16.gmra.mxu1 %v1336_v18  ;;  %v1587_v40 = vadd.f32 %v1586_v8, %v1498_v24  ;;  %v942_v8 = vmul.f32 %v2888_v53, %v865_v13  ;;  %v943_v17 = vmul.f32 %v2886_v52, %v869_v14  ;;  %v1301_v33 = vunpack.c.l.b16 %v1175_v23 }
 0x14f   : > { %v745_v18 = vmul.f32 %v2882_v49, %v668_v4  ;;  %v1005_v27 = vadd.f32 %v941_v16, %v743_v54  ;;  %v1302_v34 = vunpack.c.h.b16 %v1175_v23  ;;  %v1303_v0 = vunpack.c.l.b16 %v1176_v26 }
 0x150   : > { %v1657_v38 = vmax.f32 %v1587_v40, 0.0  ;;  %v1006_v28 = vadd.f32 %v942_v8, %v744_v15  ;;  %v1304_v37 = vunpack.c.h.b16 %v1176_v26  ;;  %v1080_v46 = vadd.f32 %v3055_v11, %v1008_v32 }
 0x151   : > { %v1007_v31 = vadd.f32 %v943_v17, %v745_v18  ;;  %v1339_v48 = vpack.c.b16 %v1303_v0, %v1301_v33 }
 0x152   : > { %v673_v30 = vpop.permute.xlu1 %672  ;;  %v1340_v51 = vpack.c.b16 %v1304_v37, %v1302_v34 }
 0x153   : > { %v1499_v35 = vpop.f32.mrf.mxu0  ;;  %v1588_v36 = vpop.f32.mrf.mxu1  ;;  %v1079_v45 = vadd.f32 %v3053_v10, %v1007_v31 }
 0x154   : > { %v1500_v39 = vadd.f32 %v3077_v60, %v1499_v35 }
 0x155   : > { %v1143_v56 = vmax.f32 %v1079_v45, 0.0 }
 0x156   : > { %v1589_v41 = vadd.f32 %v1588_v36, %v1500_v39  ;;  %v1077_v39 = vadd.f32 %v3053_v10, %v1005_v27 }
 0x158   : > { %v1658_v43 = vmax.f32 %v1589_v41, 0.0  ;;  %v1078_v41 = vadd.f32 %v3055_v11, %v1006_v28  ;;  %v1141_v55 = vmax.f32 %v1077_v39, 0.0 }
 0x15a   : > { %v1686_v44 = vpack.c.bf16 %v1658_v43, %v1657_v38  ;;  %v1142_v42 = vmax.f32 %v1078_v41, 0.0  ;;  %v1144_v38 = vmax.f32 %v1080_v46, 0.0  ;;  %v873_v43 = vpop.permute.xlu0 %872  ;;  %v877_v58 = vpop.permute.xlu1 %876  ;;  %v2535_v41 = vld [vmem:[%s3168_s27 + $0x28] sm:$0xff] }
 0x15b   : > { %v1502_v59 = vpop.f32.mrf.mxu0  ;;  %v1591_v61 = vpop.f32.mrf.mxu1  ;;  %v945_v63 = vmul.f32 %v2886_v52, %v873_v43  ;;  %v946_v2 = vmul.f32 %v2888_v53, %v873_v43  ;;  %v947_v9 = vmul.f32 %v2886_v52, %v877_v58 }
 0x15c   : > { %1790 = vmatmul.bf16.gmra.mxu2 %v1686_v44  ;;  %v1503_v12 = vadd.f32 %v3077_v60, %v1502_v59  ;;  %v678_v44 = vpop.permute.xlu2 %677  ;;  %v747_v59 = vmul.f32 %v2882_v49, %v673_v30  ;;  %v1177_v6 = vpack.c.bf16 %v1142_v42, %v1141_v55  ;;  %v1178_v7 = vpack.c.bf16 %v1144_v38, %v1143_v56  ;;  %v2534_v42 = vld [vmem:[%s3168_s27 + $0x20] sm:$0xff] }
 0x15e   : > { %1541 = vmatmul.bf16.gmra.mxu0 %v1337_v62  ;;  %1630 = vmatmul.bf16.gmra.mxu1 %v1338_v3  ;;  %v1592_v24 = vadd.f32 %v1591_v61, %v1503_v12  ;;  %v748_v61 = vmul.f32 %v2884_v50, %v673_v30  ;;  %v749_v62 = vmul.f32 %v2882_v49, %v678_v44  ;;  %v1305_v8 = vunpack.c.l.b16 %v1177_v6 }
 0x15f   : > { %v750_v3 = vmul.f32 %v2884_v50, %v678_v44  ;;  %v948_v12 = vmul.f32 %v2888_v53, %v877_v58  ;;  %v1009_v14 = vadd.f32 %v945_v63, %v747_v59  ;;  %v1307_v17 = vunpack.c.l.b16 %v1178_v7  ;;  %v2532_v59 = vld [vmem:[%s3168_s27 + $0x10] sm:$0xff] }
 0x160   : > { %v1659_v35 = vmax.f32 %v1592_v24, 0.0  ;;  %v1010_v15 = vadd.f32 %v946_v2, %v748_v61  ;;  %v1306_v49 = vunpack.c.h.b16 %v1177_v6  ;;  %v1308_v18 = vunpack.c.h.b16 %v1178_v7 }
 0x161   : > { %v1011_v50 = vadd.f32 %v947_v9, %v749_v62  ;;  %v1012_v19 = vadd.f32 %v948_v12, %v750_v3  ;;  %v1081_v52 = vadd.f32 %v3053_v10, %v1009_v14  ;;  %v1341_v27 = vpack.c.b16 %v1307_v17, %v1305_v8  ;;  %v2530_v9 = vld [vmem:[%s3168_s27] sm:$0xff] }
 0x162   : > { %v1082_v53 = vadd.f32 %v3055_v11, %v1010_v15  ;;  %v1342_v28 = vpack.c.b16 %v1308_v18, %v1306_v49 }
 0x163   : > { %v1504_v21 = vpop.f32.mrf.mxu0  ;;  %v1593_v22 = vpop.f32.mrf.mxu1  ;;  %v1084_v26 = vadd.f32 %v3055_v11, %v1012_v19  ;;  %v1145_v30 = vmax.f32 %v1081_v52, 0.0  ;;  %v3192_v52 = vld [vmem:[%s460_s28] ss:$0 sm:$0xff] }
 0x164   : > { %v1505_v25 = vadd.f32 %v3077_v60, %v1504_v21  ;;  %v1146_v31 = vmax.f32 %v1082_v53, 0.0 }
 0x165   : > { %v1148_v33 = vmax.f32 %v1084_v26, 0.0 }
 0x166   : > { %v1594_v29 = vadd.f32 %v1593_v22, %v1505_v25  ;;  %v1083_v25 = vadd.f32 %v3053_v10, %v1011_v50  ;;  %v1179_v10 = vpack.c.bf16 %v1146_v31, %v1145_v30 }
 0x168   : > { %v1660_v36 = vmax.f32 %v1594_v29, 0.0  ;;  %v2537_v29 = vld [vmem:[%s3168_s27 + $0x38] sm:$0xff]  ;;  %v1147_v32 = vmax.f32 %v1083_v25, 0.0  ;;  %v1309_v45 = vunpack.c.l.b16 %v1179_v10  ;;  %v1310_v46 = vunpack.c.h.b16 %v1179_v10 }
 0x169   : > { %1972 = vmatpush.bf16.msra.mxu3 %v2537_v29 }
 0x16a   : > { %v1687_v40 = vpack.c.bf16 %v1660_v36, %v1659_v35  ;;  %v2536_v35 = vld [vmem:[%s3168_s27 + $0x30] sm:$0xff]  ;;  %v1180_v11 = vpack.c.bf16 %v1148_v33, %v1147_v32 }
 0x16b   : > { %v1507_v1 = vpop.f32.mrf.mxu0  ;;  %v1596_v47 = vpop.f32.mrf.mxu1 }
 0x16c   : > { %1795 = vmatmul.bf16.gmra.mxu2 %v1687_v40  ;;  %v1508_v57 = vadd.f32 %v3077_v60, %v1507_v1 }
 0x16d   : > { %1973 = vmatpush.bf16.msra.mxu3 %v2536_v35 }
 0x16e   : > { %1546 = vmatmul.bf16.gmra.mxu0 %v1339_v48  ;;  %1635 = vmatmul.bf16.gmra.mxu1 %v1340_v51  ;;  %v1597_v54 = vadd.f32 %v1596_v47, %v1508_v57  ;;  %v1311_v48 = vunpack.c.l.b16 %v1180_v11  ;;  %v1312_v51 = vunpack.c.h.b16 %v1180_v11  ;;  %v2533_v57 = vld [vmem:[%s3168_s27 + $0x18] sm:$0xff] }
 0x170   : > { %v1661_v20 = vmax.f32 %v1597_v54, 0.0  ;;  %v1343_v43 = vpack.c.b16 %v1311_v48, %v1309_v45  ;;  %v1344_v44 = vpack.c.b16 %v1312_v51, %v1310_v46 }
 0x171   : > { %1974 = vmatpush.bf16.msra.mxu3 %v2535_v41 }
 0x173   : > { %v1509_v4 = vpop.f32.mrf.mxu0  ;;  %v1598_v5 = vpop.f32.mrf.mxu1 }
 0x174   : > { %v1510_v13 = vadd.f32 %v3077_v60, %v1509_v4  ;;  %v2531_v4 = vld [vmem:[%s3168_s27 + $0x8] sm:$0xff] }
 0x175   : > { %1975 = vmatpush.bf16.msra.mxu3 %v2534_v42 }
 0x176   : > { %v1599_v16 = vadd.f32 %v1598_v5, %v1510_v13 }
 0x178   : > { %v1662_v21 = vmax.f32 %v1599_v16, 0.0 }
 0x179   : > { %1976 = vmatpush.bf16.msra.mxu3 %v2533_v57 }
 0x17a   : > { %v1688_v22 = vpack.c.bf16 %v1662_v21, %v1661_v20 }
 0x17b   : > { %v1512_v23 = vpop.f32.mrf.mxu0  ;;  %v1601_v24 = vpop.f32.mrf.mxu1 }
 0x17c   : > { %1800 = vmatmul.bf16.gmra.mxu2 %v1688_v22  ;;  %v1513_v34 = vadd.f32 %v3077_v60, %v1512_v23 }
 0x17d   : > { %1977 = vmatpush.bf16.msra.mxu3 %v2532_v59 }
 0x17e   : > { %1551 = vmatmul.bf16.gmra.mxu0 %v1341_v27  ;;  %1640 = vmatmul.bf16.gmra.mxu1 %v1342_v28  ;;  %v1602_v37 = vadd.f32 %v1601_v24, %v1513_v34 }
 0x180   : > { %v1663_v1 = vmax.f32 %v1602_v37, 0.0 }
 0x181   : > { %1978 = vmatpush.bf16.msra.mxu3 %v2531_v4 }
 0x183   : > { %v1514_v36 = vpop.f32.mrf.mxu0  ;;  %v1603_v0 = vpop.f32.mrf.mxu1 }
 0x184   : > { %v1515_v40 = vadd.f32 %v3077_v60, %v1514_v36 }
 0x185   : > { %1979 = vmatpush.bf16.msra.mxu3 %v2530_v9 }
 0x186   : > { %v1604_v39 = vadd.f32 %v1603_v0, %v1515_v40 }
 0x188   : > { %v1664_v47 = vmax.f32 %v1604_v39, 0.0 }
 0x18a   : > { %v1689_v55 = vpack.c.bf16 %v1664_v47, %v1663_v1 }
 0x18b   : > { %v1517_v56 = vpop.f32.mrf.mxu0  ;;  %v1606_v38 = vpop.f32.mrf.mxu1 }
 0x18c   : > { %1805 = vmatmul.bf16.gmra.mxu2 %v1689_v55  ;;  %v1518_v58 = vadd.f32 %v3077_v60, %v1517_v56 }
 0x18e   : > { %1556 = vmatmul.bf16.gmra.mxu0 %v1343_v43  ;;  %1645 = vmatmul.bf16.gmra.mxu1 %v1344_v44  ;;  %v1607_v2 = vadd.f32 %v1606_v38, %v1518_v58 }
 0x190   : > { %v1665_v5 = vmax.f32 %v1607_v2, 0.0 }
 0x193   : > { %v1519_v61 = vpop.f32.mrf.mxu0  ;;  %v1608_v63 = vpop.f32.mrf.mxu1 }
 0x194   : > { %v1520_v62 = vadd.f32 %v3077_v60, %v1519_v61 }
 0x196   : > { %v1609_v3 = vadd.f32 %v1608_v63, %v1520_v62 }
 0x198   : > { %v1666_v6 = vmax.f32 %v1609_v3, 0.0 }
 0x19a   : > { %v1690_v7 = vpack.c.bf16 %v1666_v6, %v1665_v5 }
 0x19b   : > { %v1522_v12 = vpop.f32.mrf.mxu0  ;;  %v1611_v54 = vpop.f32.mrf.mxu1 }
 0x19c   : > { %1810 = vmatmul.bf16.gmra.mxu2 %v1690_v7  ;;  %v1523_v13 = vadd.f32 %v3077_v60, %v1522_v12 }
 0x19e   : > { %v1612_v16 = vadd.f32 %v1611_v54, %v1523_v13 }
 0x1a0   : > { %v1667_v49 = vmax.f32 %v1612_v16, 0.0 }
 0x1a3   : > { %v1524_v14 = vpop.f32.mrf.mxu0  ;;  %v1613_v15 = vpop.f32.mrf.mxu1 }
 0x1a4   : > { %v1525_v8 = vadd.f32 %v3077_v60, %v1524_v14 }
 0x1a6   : > { %v1614_v17 = vadd.f32 %v1613_v15, %v1525_v8 }
 0x1a8   : > { %v1668_v18 = vmax.f32 %v1614_v17, 0.0 }
 0x1aa   : > { %v1691_v50 = vpack.c.bf16 %v1668_v18, %v1667_v49 }
 0x1ab   : > { %v1527_v19 = vpop.f32.mrf.mxu0  ;;  %v1616_v20 = vpop.f32.mrf.mxu1 }
 0x1ac   : > { %1815 = vmatmul.bf16.gmra.mxu2 %v1691_v50  ;;  %v1528_v22 = vadd.f32 %v3077_v60, %v1527_v19 }
 0x1ae   : > { %v1617_v24 = vadd.f32 %v1616_v20, %v1528_v22 }
 0x1af   : > { %v1776_v21 = vpop.f32.mrf.mxu2 }
 0x1b0   : > { %v1777_v26 = vadd.f32 %v3192_v52, %v1776_v21  ;;  %v1669_v29 = vmax.f32 %v1617_v24, 0.0 }
 0x1b2   : > { %v1856_v32 = vmax.f32 %v1777_v26, 0.0 }
 0x1b3   : > { %v1529_v53 = vpop.f32.mrf.mxu0  ;;  %v1618_v23 = vpop.f32.mrf.mxu1 }
 0x1b4   : > { %v1530_v25 = vadd.f32 %v3077_v60, %v1529_v53 }
 0x1b6   : > { %v1619_v27 = vadd.f32 %v1618_v23, %v1530_v25 }
 0x1b7   : > { %v1778_v28 = vpop.f32.mrf.mxu2 }
 0x1b8   : > { %v1670_v30 = vmax.f32 %v1619_v27, 0.0  ;;  %v1779_v31 = vadd.f32 %v3192_v52, %v1778_v28 }
 0x1ba   : > { %v1857_v33 = vmax.f32 %v1779_v31, 0.0  ;;  %v1692_v34 = vpack.c.bf16 %v1670_v30, %v1669_v29 }
 0x1bb   : > { %v1532_v35 = vpop.f32.mrf.mxu0  ;;  %v1621_v36 = vpop.f32.mrf.mxu1 }
 0x1bc   : > { %1820 = vmatmul.bf16.gmra.mxu2 %v1692_v34  ;;  %v1888_v0 = vpack.c.bf16 %v1857_v33, %v1856_v32  ;;  %v1533_v11 = vadd.f32 %v3077_v60, %v1532_v35 }
 0x1be   : > { %1980 = vmatmul.bf16.vlgmr.msra.gmra.mxu3 %v1888_v0  ;;  %v1622_v39 = vadd.f32 %v1621_v36, %v1533_v11 }
 0x1bf   : > { %v1781_v10 = vpop.f32.mrf.mxu2 }
 0x1c0   : > { %v1782_v45 = vadd.f32 %v3192_v52, %v1781_v10  ;;  %v1671_v47 = vmax.f32 %v1622_v39, 0.0 }
 0x1c2   : > { %v1858_v55 = vmax.f32 %v1782_v45, 0.0 }
 0x1c3   : > { %v1534_v37 = vpop.f32.mrf.mxu0  ;;  %v1623_v40 = vpop.f32.mrf.mxu1 }
 0x1c4   : > { %v1535_v41 = vadd.f32 %v3077_v60, %v1534_v37 }
 0x1c6   : > { %v1624_v46 = vadd.f32 %v1623_v40, %v1535_v41 }
 0x1c7   : > { %v1783_v1 = vpop.f32.mrf.mxu2 }
 0x1c8   : > { %v1672_v48 = vmax.f32 %v1624_v46, 0.0  ;;  %v1784_v51 = vadd.f32 %v3192_v52, %v1783_v1 }
 0x1ca   : > { %v1859_v42 = vmax.f32 %v1784_v51, 0.0  ;;  %v1693_v56 = vpack.c.bf16 %v1672_v48, %v1671_v47 }
 0x1cb   : > { %v1537_v38 = vpop.f32.mrf.mxu0  ;;  %v1626_v43 = vpop.f32.mrf.mxu1 }
 0x1cc   : > { %1825 = vmatmul.bf16.gmra.mxu2 %v1693_v56  ;;  %v1889_v44 = vpack.c.bf16 %v1859_v42, %v1858_v55  ;;  %v1538_v58 = vadd.f32 %v3077_v60, %v1537_v38 }
 0x1ce   : > { %1985 = vmatmul.bf16.gmra.mxu3 %v1889_v44  ;;  %v1627_v63 = vadd.f32 %v1626_v43, %v1538_v58 }
 0x1cf   : > { %v1786_v57 = vpop.f32.mrf.mxu2 }
 0x1d0   : > { %v1787_v62 = vadd.f32 %v3192_v52, %v1786_v57  ;;  %v1673_v5 = vmax.f32 %v1627_v63, 0.0 }
 0x1d2   : > { %v1860_v9 = vmax.f32 %v1787_v62, 0.0 }
 0x1d3   : > { %v1539_v59 = vpop.f32.mrf.mxu0  ;;  %v1628_v61 = vpop.f32.mrf.mxu1 }
 0x1d4   : > { %v1540_v2 = vadd.f32 %v3077_v60, %v1539_v59 }
 0x1d6   : > { %v1629_v3 = vadd.f32 %v1628_v61, %v1540_v2 }
 0x1d7   : > { %v1788_v4 = vpop.f32.mrf.mxu2 }
 0x1d8   : > { %v1674_v6 = vmax.f32 %v1629_v3, 0.0  ;;  %v1789_v7 = vadd.f32 %v3192_v52, %v1788_v4 }
 0x1da   : > { %v1861_v12 = vmax.f32 %v1789_v7, 0.0  ;;  %v1694_v54 = vpack.c.bf16 %v1674_v6, %v1673_v5 }
 0x1db   : > { %v1542_v13 = vpop.f32.mrf.mxu0  ;;  %v1631_v14 = vpop.f32.mrf.mxu1 }
 0x1dc   : > { %1830 = vmatmul.bf16.gmra.mxu2 %v1694_v54  ;;  %v1890_v15 = vpack.c.bf16 %v1861_v12, %v1860_v9  ;;  %v1543_v8 = vadd.f32 %v3077_v60, %v1542_v13 }
 0x1de   : > { %1990 = vmatmul.bf16.gmra.mxu3 %v1890_v15  ;;  %v1632_v18 = vadd.f32 %v1631_v14, %v1543_v8 }
 0x1df   : > { %v1791_v16 = vpop.f32.mrf.mxu2 }
 0x1e0   : > { %v1792_v19 = vadd.f32 %v3192_v52, %v1791_v16  ;;  %v1675_v22 = vmax.f32 %v1632_v18, 0.0 }
 0x1e2   : > { %v1862_v24 = vmax.f32 %v1792_v19, 0.0 }
 0x1e3   : > { %v1544_v17 = vpop.f32.mrf.mxu0  ;;  %v1633_v49 = vpop.f32.mrf.mxu1 }
 0x1e4   : > { %v1545_v50 = vadd.f32 %v3077_v60, %v1544_v17 }
 0x1e6   : > { %v1634_v20 = vadd.f32 %v1633_v49, %v1545_v50 }
 0x1e7   : > { %v1793_v21 = vpop.f32.mrf.mxu2 }
 0x1e8   : > { %v1676_v53 = vmax.f32 %v1634_v20, 0.0  ;;  %v1794_v23 = vadd.f32 %v3192_v52, %v1793_v21 }
 0x1ea   : > { %v1695_v25 = vpack.c.bf16 %v1676_v53, %v1675_v22  ;;  %v1863_v26 = vmax.f32 %v1794_v23, 0.0 }
 0x1eb   : > { %v1547_v27 = vpop.f32.mrf.mxu0  ;;  %v1636_v28 = vpop.f32.mrf.mxu1 }
 0x1ec   : > { %1835 = vmatmul.bf16.gmra.mxu2 %v1695_v25  ;;  %v1891_v29 = vpack.c.bf16 %v1863_v26, %v1862_v24  ;;  %v1548_v31 = vadd.f32 %v3077_v60, %v1547_v27 }
 0x1ee   : > { %1995 = vmatmul.bf16.gmra.mxu3 %v1891_v29  ;;  %v1637_v34 = vadd.f32 %v1636_v28, %v1548_v31 }
 0x1ef   : > { %v1796_v30 = vpop.f32.mrf.mxu2 }
 0x1f0   : > { %v1797_v36 = vadd.f32 %v3192_v52, %v1796_v30  ;;  %v1677_v11 = vmax.f32 %v1637_v34, 0.0 }
 0x1f2   : > { %v1864_v39 = vmax.f32 %v1797_v36, 0.0 }
 0x1f3   : > { %v1549_v32 = vpop.f32.mrf.mxu0  ;;  %v1638_v33 = vpop.f32.mrf.mxu1 }
 0x1f4   : > { %v1550_v35 = vadd.f32 %v3077_v60, %v1549_v32 }
 0x1f6   : > { %v1639_v0 = vadd.f32 %v1638_v33, %v1550_v35  ;;  %v3230_v33 = vld [vmem:[%s468_s14] ss:$0 sm:$0xff]  ;;  %s2355_s14 = sshll.u32 %s427_s18, 3 }
 0x1f7   : > { %v1798_v10 = vpop.f32.mrf.mxu2  ;;  %s429_s25 = scalar_lea.vmem [#allocation2], %s2355_s14 }
 0x1f8   : > { %v1678_v37 = vmax.f32 %v1639_v0, 0.0  ;;  %v1799_v40 = vadd.f32 %v3192_v52, %v1798_v10 }
 0x1fa   : > { %v1696_v41 = vpack.c.bf16 %v1678_v37, %v1677_v11  ;;  %v1865_v45 = vmax.f32 %v1799_v40, 0.0 }
 0x1fb   : > { %v1552_v46 = vpop.f32.mrf.mxu0  ;;  %v1641_v1 = vpop.f32.mrf.mxu1 }
 0x1fc   : > { %1840 = vmatmul.bf16.gmra.mxu2 %v1696_v41  ;;  %v1892_v47 = vpack.c.bf16 %v1865_v45, %v1864_v39  ;;  %v1553_v51 = vadd.f32 %v3077_v60, %v1552_v46 }
 0x1fe   : > { %2000 = vmatmul.bf16.gmra.mxu3 %v1892_v47  ;;  %v1642_v56 = vadd.f32 %v1641_v1, %v1553_v51 }
 0x1ff   : > { %v1801_v48 = vpop.f32.mrf.mxu2 }
 0x200   : > { %v1802_v43 = vadd.f32 %v3192_v52, %v1801_v48  ;;  %v1679_v58 = vmax.f32 %v1642_v56, 0.0 }
 0x202   : > { %v1866_v63 = vmax.f32 %v1802_v43, 0.0 }
 0x203   : > { %v1554_v55 = vpop.f32.mrf.mxu0  ;;  %v1643_v42 = vpop.f32.mrf.mxu1 }
 0x204   : > { %v1555_v38 = vadd.f32 %v3077_v60, %v1554_v55 }
 0x206   : > { %v1644_v44 = vadd.f32 %v1643_v42, %v1555_v38 }
 0x207   : > { %v1803_v57 = vpop.f32.mrf.mxu2 }
 0x208   : > { %v1680_v59 = vmax.f32 %v1644_v44, 0.0  ;;  %v1804_v61 = vadd.f32 %v3192_v52, %v1803_v57 }
 0x20a   : > { %v1697_v2 = vpack.c.bf16 %v1680_v59, %v1679_v58  ;;  %v1867_v62 = vmax.f32 %v1804_v61, 0.0 }
 0x20b   : > { %v1557_v3 = vpop.f32.mrf.mxu0  ;;  %v1646_v4 = vpop.f32.mrf.mxu1 }
 0x20c   : > { %1845 = vmatmul.bf16.gmra.mxu2 %v1697_v2  ;;  %v1893_v5 = vpack.c.bf16 %v1867_v62, %v1866_v63  ;;  %v1558_v7 = vadd.f32 %v3077_v60, %v1557_v3 }
 0x20e   : > { %2005 = vmatmul.bf16.gmra.mxu3 %v1893_v5  ;;  %v1647_v12 = vadd.f32 %v1646_v4, %v1558_v7 }
 0x20f   : > { %v1806_v6 = vpop.f32.mrf.mxu2 }
 0x210   : > { %v1807_v14 = vadd.f32 %v3192_v52, %v1806_v6  ;;  %v1681_v8 = vmax.f32 %v1647_v12, 0.0 }
 0x212   : > { %v1868_v18 = vmax.f32 %v1807_v14, 0.0 }
 0x213   : > { %v1559_v9 = vpop.f32.mrf.mxu0  ;;  %v1648_v13 = vpop.f32.mrf.mxu1 }
 0x214   : > { %v1560_v54 = vadd.f32 %v3077_v60, %v1559_v9 }
 0x216   : > { %v1649_v15 = vadd.f32 %v1648_v13, %v1560_v54 }
 0x217   : > { %v1808_v16 = vpop.f32.mrf.mxu2 }
 0x218   : > { %v1682_v17 = vmax.f32 %v1649_v15, 0.0  ;;  %v1809_v49 = vadd.f32 %v3192_v52, %v1808_v16 }
 0x21a   : > { %v1698_v50 = vpack.c.bf16 %v1682_v17, %v1681_v8  ;;  %v1869_v19 = vmax.f32 %v1809_v49, 0.0 }
 0x21c   : > { %1850 = vmatmul.bf16.gmra.mxu2 %v1698_v50  ;;  %v1894_v20 = vpack.c.bf16 %v1869_v19, %v1868_v18 }
 0x21e   : > { %2010 = vmatmul.bf16.gmra.mxu3 %v1894_v20 }
 0x21f   : > { %v1811_v21 = vpop.f32.mrf.mxu2 }
 0x220   : > { %v1812_v22 = vadd.f32 %v3192_v52, %v1811_v21 }
 0x222   : > { %v1870_v23 = vmax.f32 %v1812_v22, 0.0 }
 0x227   : > { %v1813_v60 = vpop.f32.mrf.mxu2 }
 0x228   : > { %v1814_v53 = vadd.f32 %v3192_v52, %v1813_v60 }
 0x22a   : > { %v1871_v24 = vmax.f32 %v1814_v53, 0.0 }
 0x22c   : > { %v1895_v25 = vpack.c.bf16 %v1871_v24, %v1870_v23 }
 0x22e   : > { %2015 = vmatmul.bf16.gmra.mxu3 %v1895_v25 }
 0x22f   : > { %v1816_v26 = vpop.f32.mrf.mxu2 }
 0x230   : > { %v1817_v27 = vadd.f32 %v3192_v52, %v1816_v26 }
 0x232   : > { %v1872_v30 = vmax.f32 %v1817_v27, 0.0 }
 0x237   : > { %v1818_v28 = vpop.f32.mrf.mxu2 }
 0x238   : > { %v1819_v29 = vadd.f32 %v3192_v52, %v1818_v28 }
 0x23a   : > { %v1873_v31 = vmax.f32 %v1819_v29, 0.0 }
 0x23c   : > { %v1896_v32 = vpack.c.bf16 %v1873_v31, %v1872_v30 }
 0x23e   : > { %2020 = vmatmul.bf16.gmra.mxu3 %v1896_v32 }
 0x23f   : > { %v1821_v34 = vpop.f32.mrf.mxu2 }
 0x240   : > { %v1822_v0 = vadd.f32 %v3192_v52, %v1821_v34 }
 0x241   : > { %v1981_v35 = vpop.f32.mrf.mxu3 }
 0x242   : > { %v1982_v36 = vadd.f32 %v3230_v33, %v1981_v35  ;;  %v1874_v39 = vmax.f32 %v1822_v0, 0.0 }
 0x244   : > { %2605 = vtanh.f32 %v1982_v36 }
 0x247   : > { %v1823_v10 = vpop.f32.mrf.mxu2 }
 0x248   : > { %v1824_v11 = vadd.f32 %v3192_v52, %v1823_v10 }
 0x249   : > { %v1983_v37 = vpop.f32.mrf.mxu3 }
 0x24a   : > { %v2606_v40 = vpop.eup %2605  ;;  %v1875_v41 = vmax.f32 %v1824_v11, 0.0  ;;  %v1984_v45 = vadd.f32 %v3230_v33, %v1983_v37 }
 0x24b   : > { %2093 = vxpose.xlu2.b32.start [1/16] (narrow) %v2606_v40, 8 }
 0x24c   : > { %2607 = vtanh.f32 %v1984_v45  ;;  %v1897_v46 = vpack.c.bf16 %v1875_v41, %v1874_v39 }
 0x24e   : > { %2025 = vmatmul.bf16.gmra.mxu3 %v1897_v46 }
 0x24f   : > { %v1826_v1 = vpop.f32.mrf.mxu2 }
 0x250   : > { %v1827_v55 = vadd.f32 %v3192_v52, %v1826_v1 }
 0x251   : > { %v1986_v47 = vpop.f32.mrf.mxu3 }
 0x252   : > { %v2608_v48 = vpop.eup %2607  ;;  %v1987_v51 = vadd.f32 %v3230_v33, %v1986_v47  ;;  %v1876_v44 = vmax.f32 %v1827_v55, 0.0 }
 0x253   : > { %2094 = vxpose.xlu2.b32.cont [2/16] (narrow) %v2608_v48, 8 }
 0x254   : > { %2609 = vtanh.f32 %v1987_v51 }
 0x257   : > { %v1828_v42 = vpop.f32.mrf.mxu2 }
 0x258   : > { %v1829_v56 = vadd.f32 %v3192_v52, %v1828_v42 }
 0x259   : > { %v1988_v38 = vpop.f32.mrf.mxu3 }
 0x25a   : > { %v2610_v43 = vpop.eup %2609  ;;  %v1877_v57 = vmax.f32 %v1829_v56, 0.0  ;;  %v1989_v58 = vadd.f32 %v3230_v33, %v1988_v38 }
 0x25b   : > { %2095 = vxpose.xlu2.b32.cont [3/16] (narrow) %v2610_v43, 8 }
 0x25c   : > { %2611 = vtanh.f32 %v1989_v58  ;;  %v1898_v59 = vpack.c.bf16 %v1877_v57, %v1876_v44 }
 0x25e   : > { %2030 = vmatmul.bf16.gmra.mxu3 %v1898_v59 }
 0x25f   : > { %v1831_v61 = vpop.f32.mrf.mxu2 }
 0x260   : > { %v1832_v3 = vadd.f32 %v3192_v52, %v1831_v61 }
 0x261   : > { %v1991_v63 = vpop.f32.mrf.mxu3 }
 0x262   : > { %v2612_v2 = vpop.eup %2611  ;;  %v1992_v62 = vadd.f32 %v3230_v33, %v1991_v63  ;;  %v1878_v9 = vmax.f32 %v1832_v3, 0.0 }
 0x263   : > { %2096 = vxpose.xlu2.b32.cont [4/16] (narrow) %v2612_v2, 8 }
 0x264   : > { %2613 = vtanh.f32 %v1992_v62 }
 0x267   : > { %v1833_v4 = vpop.f32.mrf.mxu2 }
 0x268   : > { %v1834_v5 = vadd.f32 %v3192_v52, %v1833_v4 }
 0x269   : > { %v1993_v6 = vpop.f32.mrf.mxu3 }
 0x26a   : > { %v2614_v7 = vpop.eup %2613  ;;  %v1879_v12 = vmax.f32 %v1834_v5, 0.0  ;;  %v1994_v54 = vadd.f32 %v3230_v33, %v1993_v6 }
 0x26b   : > { %2097 = vxpose.xlu2.b32.cont [5/16] (narrow) %v2614_v7, 8 }
 0x26c   : > { %2615 = vtanh.f32 %v1994_v54  ;;  %v1899_v13 = vpack.c.bf16 %v1879_v12, %v1878_v9 }
 0x26e   : > { %2035 = vmatmul.bf16.gmra.mxu3 %v1899_v13 }
 0x26f   : > { %v1836_v14 = vpop.f32.mrf.mxu2 }
 0x270   : > { %v1837_v17 = vadd.f32 %v3192_v52, %v1836_v14 }
 0x271   : > { %v1996_v15 = vpop.f32.mrf.mxu3 }
 0x272   : > { %v2616_v16 = vpop.eup %2615  ;;  %v1997_v8 = vadd.f32 %v3230_v33, %v1996_v15  ;;  %v1880_v20 = vmax.f32 %v1837_v17, 0.0 }
 0x273   : > { %2098 = vxpose.xlu2.b32.cont [6/16] (narrow) %v2616_v16, 8 }
 0x274   : > { %2617 = vtanh.f32 %v1997_v8 }
 0x277   : > { %v1838_v49 = vpop.f32.mrf.mxu2 }
 0x278   : > { %v1839_v18 = vadd.f32 %v3192_v52, %v1838_v49 }
 0x279   : > { %v1998_v50 = vpop.f32.mrf.mxu3 }
 0x27a   : > { %v2618_v19 = vpop.eup %2617  ;;  %v1881_v21 = vmax.f32 %v1839_v18, 0.0  ;;  %v1999_v22 = vadd.f32 %v3230_v33, %v1998_v50 }
 0x27b   : > { %2099 = vxpose.xlu2.b32.cont [7/16] (narrow) %v2618_v19, 8 }
 0x27c   : > { %v1900_v60 = vpack.c.bf16 %v1881_v21, %v1880_v20  ;;  %2619 = vtanh.f32 %v1999_v22 }
 0x27e   : > { %2040 = vmatmul.bf16.gmra.mxu3 %v1900_v60 }
 0x27f   : > { %v1841_v53 = vpop.f32.mrf.mxu2 }
 0x280   : > { %v1842_v26 = vadd.f32 %v3192_v52, %v1841_v53 }
 0x281   : > { %v2001_v23 = vpop.f32.mrf.mxu3 }
 0x282   : > { %v2620_v24 = vpop.eup %2619  ;;  %v2002_v25 = vadd.f32 %v3230_v33, %v2001_v23  ;;  %v1882_v31 = vmax.f32 %v1842_v26, 0.0 }
 0x283   : > { %2100 = vxpose.xlu2.b32.cont [8/16] (narrow) %v2620_v24, 8 }
 0x284   : > { %2621 = vtanh.f32 %v2002_v25 }
 0x287   : > { %v1843_v27 = vpop.f32.mrf.mxu2 }
 0x288   : > { %v1844_v28 = vadd.f32 %v3192_v52, %v1843_v27 }
 0x289   : > { %v2003_v29 = vpop.f32.mrf.mxu3 }
 0x28a   : > { %v2622_v30 = vpop.eup %2621  ;;  %v1883_v32 = vmax.f32 %v1844_v28, 0.0  ;;  %v2004_v34 = vadd.f32 %v3230_v33, %v2003_v29 }
 0x28b   : > { %2101 = vxpose.xlu2.b32.cont [9/16] (narrow) %v2622_v30, 8 }
 0x28c   : > { %v1901_v35 = vpack.c.bf16 %v1883_v32, %v1882_v31  ;;  %2623 = vtanh.f32 %v2004_v34 }
 0x28e   : > { %2045 = vmatmul.bf16.gmra.mxu3 %v1901_v35 }
 0x28f   : > { %v1846_v36 = vpop.f32.mrf.mxu2 }
 0x290   : > { %v1847_v37 = vadd.f32 %v3192_v52, %v1846_v36 }
 0x291   : > { %v2006_v0 = vpop.f32.mrf.mxu3 }
 0x292   : > { %v2624_v10 = vpop.eup %2623  ;;  %v2007_v11 = vadd.f32 %v3230_v33, %v2006_v0  ;;  %v1884_v46 = vmax.f32 %v1847_v37, 0.0 }
 0x293   : > { %2102 = vxpose.xlu2.b32.cont [10/16] (narrow) %v2624_v10, 8 }
 0x294   : > { %2625 = vtanh.f32 %v2007_v11 }
 0x297   : > { %v1848_v40 = vpop.f32.mrf.mxu2 }
 0x298   : > { %v1849_v39 = vadd.f32 %v3192_v52, %v1848_v40 }
 0x299   : > { %v2008_v41 = vpop.f32.mrf.mxu3 }
 0x29a   : > { %v2626_v45 = vpop.eup %2625  ;;  %v1885_v1 = vmax.f32 %v1849_v39, 0.0  ;;  %v2009_v47 = vadd.f32 %v3230_v33, %v2008_v41 }
 0x29b   : > { %2103 = vxpose.xlu2.b32.cont [11/16] (narrow) %v2626_v45, 8 }
 0x29c   : > { %v1902_v48 = vpack.c.bf16 %v1885_v1, %v1884_v46  ;;  %2627 = vtanh.f32 %v2009_v47 }
 0x29e   : > { %2050 = vmatmul.bf16.gmra.mxu3 %v1902_v48 }
 0x29f   : > { %v1851_v51 = vpop.f32.mrf.mxu2 }
 0x2a0   : > { %v1852_v38 = vadd.f32 %v3192_v52, %v1851_v51 }
 0x2a1   : > { %v2011_v55 = vpop.f32.mrf.mxu3 }
 0x2a2   : > { %v2628_v42 = vpop.eup %2627  ;;  %v2012_v56 = vadd.f32 %v3230_v33, %v2011_v55  ;;  %v1886_v59 = vmax.f32 %v1852_v38, 0.0 }
 0x2a3   : > { %2104 = vxpose.xlu2.b32.cont [12/16] (narrow) %v2628_v42, 8 }
 0x2a4   : > { %2629 = vtanh.f32 %v2012_v56 }
 0x2a7   : > { %v1853_v43 = vpop.f32.mrf.mxu2 }
 0x2a8   : > { %v1854_v44 = vadd.f32 %v3192_v52, %v1853_v43 }
 0x2a9   : > { %v2013_v57 = vpop.f32.mrf.mxu3 }
 0x2aa   : > { %v2630_v58 = vpop.eup %2629  ;;  %v1887_v61 = vmax.f32 %v1854_v44, 0.0  ;;  %v2014_v63 = vadd.f32 %v3230_v33, %v2013_v57 }
 0x2ab   : > { %2105 = vxpose.xlu2.b32.cont [13/16] (narrow) %v2630_v58, 8 }
 0x2ac   : > { %v1903_v2 = vpack.c.bf16 %v1887_v61, %v1886_v59  ;;  %2631 = vtanh.f32 %v2014_v63 }
 0x2ae   : > { %2055 = vmatmul.bf16.gmra.mxu3 %v1903_v2 }
 0x2b1   : > { %v2016_v62 = vpop.f32.mrf.mxu3 }
 0x2b2   : > { %v2632_v3 = vpop.eup %2631  ;;  %v2017_v4 = vadd.f32 %v3230_v33, %v2016_v62 }
 0x2b3   : > { %2106 = vxpose.xlu2.b32.cont [14/16] (narrow) %v2632_v3, 8 }
 0x2b4   : > { %2633 = vtanh.f32 %v2017_v4 }
 0x2b9   : > { %v2018_v5 = vpop.f32.mrf.mxu3 }
 0x2ba   : > { %v2634_v6 = vpop.eup %2633  ;;  %v2019_v52 = vadd.f32 %v3230_v33, %v2018_v5 }
 0x2bb   : > { %2107 = vxpose.xlu2.b32.cont [15/16] (narrow) %v2634_v6, 8 }
 0x2bc   : > { %2635 = vtanh.f32 %v2019_v52 }
 0x2c1   : > { %v2021_v7 = vpop.f32.mrf.mxu3 }
 0x2c2   : > { %v2636_v9 = vpop.eup %2635  ;;  %v2022_v12 = vadd.f32 %v3230_v33, %v2021_v7 }
 0x2c3   : > { %2108 = vxpose.xlu2.b32.end [16/16] (narrow) %v2636_v9, 8 }
 0x2c4   : > { %2637 = vtanh.f32 %v2022_v12 }
 0x2c9   : > { %v2023_v54 = vpop.f32.mrf.mxu3 }
 0x2ca   : > { %v2638_v13 = vpop.eup %2637  ;;  %v2024_v14 = vadd.f32 %v3230_v33, %v2023_v54 }
 0x2cb   : > { %2125 = vxpose.xlu0.b32.start [1/16] (narrow) %v2638_v13, 8 }
 0x2cc   : > { %2639 = vtanh.f32 %v2024_v14 }
 0x2d1   : > { %v2026_v15 = vpop.f32.mrf.mxu3 }
 0x2d2   : > { %v2640_v16 = vpop.eup %2639  ;;  %v2027_v8 = vadd.f32 %v3230_v33, %v2026_v15 }
 0x2d3   : > { %2126 = vxpose.xlu0.b32.cont [2/16] (narrow) %v2640_v16, 8 }
 0x2d4   : > { %2641 = vtanh.f32 %v2027_v8 }
 0x2d9   : > { %v2028_v17 = vpop.f32.mrf.mxu3 }
 0x2da   : > { %v2642_v49 = vpop.eup %2641  ;;  %v2029_v18 = vadd.f32 %v3230_v33, %v2028_v17 }
 0x2db   : > { %2127 = vxpose.xlu0.b32.cont [3/16] (narrow) %v2642_v49, 8 }
 0x2dc   : > { %2643 = vtanh.f32 %v2029_v18 }
 0x2e1   : > { %v2031_v50 = vpop.f32.mrf.mxu3 }
 0x2e2   : > { %v2644_v19 = vpop.eup %2643  ;;  %v2032_v20 = vadd.f32 %v3230_v33, %v2031_v50 }
 0x2e3   : > { %2128 = vxpose.xlu0.b32.cont [4/16] (narrow) %v2644_v19, 8 }
 0x2e4   : > { %2645 = vtanh.f32 %v2032_v20  ;;  %v2109_v45 = vpop.trf.xlu2 }
 0x2e5   : > { %2157 = vst [vmem:[%s429_s25] sm:$0x7] %v2109_v45 }
 0x2e9   : > { %v2033_v21 = vpop.f32.mrf.mxu3 }
 0x2ea   : > { %v2646_v22 = vpop.eup %2645  ;;  %v2034_v60 = vadd.f32 %v3230_v33, %v2033_v21 }
 0x2eb   : > { %2129 = vxpose.xlu0.b32.cont [5/16] (narrow) %v2646_v22, 8 }
 0x2ec   : > { %2647 = vtanh.f32 %v2034_v60  ;;  %v2184_v57 = vld [vmem:[%s429_s25] sm:$0xf] (%p2770_p4) }
 0x2ed   : > { %2185 = vst [vmem:[%s2167_s21] sm:$0xf] (%p2770_p4), %v2184_v57 }
 0x2f1   : > { %v2036_v53 = vpop.f32.mrf.mxu3 }
 0x2f2   : > { %v2648_v23 = vpop.eup %2647  ;;  %v2037_v24 = vadd.f32 %v3230_v33, %v2036_v53 }
 0x2f3   : > { %2130 = vxpose.xlu0.b32.cont [6/16] (narrow) %v2648_v23, 8 }
 0x2f4   : > { %2649 = vtanh.f32 %v2037_v24 }
 0x2f9   : > { %v2038_v25 = vpop.f32.mrf.mxu3 }
 0x2fa   : > { %v2650_v26 = vpop.eup %2649  ;;  %v2039_v27 = vadd.f32 %v3230_v33, %v2038_v25 }
 0x2fb   : > { %2131 = vxpose.xlu0.b32.cont [7/16] (narrow) %v2650_v26, 8 }
 0x2fc   : > { %2651 = vtanh.f32 %v2039_v27 }
 0x301   : > { %v2041_v28 = vpop.f32.mrf.mxu3 }
 0x302   : > { %v2652_v29 = vpop.eup %2651  ;;  %v2042_v30 = vadd.f32 %v3230_v33, %v2041_v28 }
 0x303   : > { %2132 = vxpose.xlu0.b32.cont [8/16] (narrow) %v2652_v29, 8 }
 0x304   : > { %2653 = vtanh.f32 %v2042_v30 }
 0x309   : > { %v2043_v31 = vpop.f32.mrf.mxu3 }
 0x30a   : > { %v2654_v32 = vpop.eup %2653  ;;  %v2044_v34 = vadd.f32 %v3230_v33, %v2043_v31 }
 0x30b   : > { %2133 = vxpose.xlu0.b32.cont [9/16] (narrow) %v2654_v32, 8 }
 0x30c   : > { %2655 = vtanh.f32 %v2044_v34 }
 0x311   : > { %v2046_v35 = vpop.f32.mrf.mxu3 }
 0x312   : > { %v2656_v36 = vpop.eup %2655  ;;  %v2047_v0 = vadd.f32 %v3230_v33, %v2046_v35 }
 0x313   : > { %2134 = vxpose.xlu0.b32.cont [10/16] (narrow) %v2656_v36, 8 }
 0x314   : > { %2657 = vtanh.f32 %v2047_v0 }
 0x319   : > { %v2048_v10 = vpop.f32.mrf.mxu3 }
 0x31a   : > { %v2658_v11 = vpop.eup %2657  ;;  %v2049_v37 = vadd.f32 %v3230_v33, %v2048_v10 }
 0x31b   : > { %2135 = vxpose.xlu0.b32.cont [11/16] (narrow) %v2658_v11, 8 }
 0x31c   : > { %2659 = vtanh.f32 %v2049_v37 }
 0x321   : > { %v2051_v40 = vpop.f32.mrf.mxu3 }
 0x322   : > { %v2660_v39 = vpop.eup %2659  ;;  %v2052_v41 = vadd.f32 %v3230_v33, %v2051_v40 }
 0x323   : > { %2136 = vxpose.xlu0.b32.cont [12/16] (narrow) %v2660_v39, 8 }
 0x324   : > { %2661 = vtanh.f32 %v2052_v41 }
 0x329   : > { %v2053_v46 = vpop.f32.mrf.mxu3 }
 0x32a   : > { %v2662_v1 = vpop.eup %2661  ;;  %v2054_v47 = vadd.f32 %v3230_v33, %v2053_v46 }
 0x32b   : > { %2137 = vxpose.xlu0.b32.cont [13/16] (narrow) %v2662_v1, 8 }
 0x32c   : > { %2663 = vtanh.f32 %v2054_v47 }
 0x331   : > { %v2056_v48 = vpop.f32.mrf.mxu3 }
 0x332   : > { %v2664_v51 = vpop.eup %2663  ;;  %v2057_v55 = vadd.f32 %v3230_v33, %v2056_v48 }
 0x333   : > { %2138 = vxpose.xlu0.b32.cont [14/16] (narrow) %v2664_v51, 8 }
 0x334   : > { %2665 = vtanh.f32 %v2057_v55 }
 0x339   : > { %v2058_v42 = vpop.f32.mrf.mxu3 }
 0x33a   : > { %v2666_v56 = vpop.eup %2665  ;;  %v2059_v38 = vadd.f32 %v3230_v33, %v2058_v42 }
 0x33b   : > { %2139 = vxpose.xlu0.b32.cont [15/16] (narrow) %v2666_v56, 8 }
 0x33c   : > { %2667 = vtanh.f32 %v2059_v38 }
 0x342   : > { %v2668_v43 = vpop.eup %2667 }
 0x343   : > { %2140 = vxpose.xlu0.b32.end [16/16] (narrow) %v2668_v43, 8 }
 0x36c   : > { %2165 = sbr.rel (!%p2770_p4) target bundleno = 889 (0x379), region = 60 }
 0x36f   : > { %v2141_v44 = vpop.trf.xlu0 }
 0x370   : > { %2158 = vst [vmem:[%s429_s25 + $0x4] sm:$0x7] %v2141_v44 }
 0x377   : > { %v2186_v58 = vld [vmem:[%s429_s25 + $0x4] sm:$0xf] }
 0x378   : > { %2187 = vst [vmem:[%s2167_s21 + $0x14] sm:$0xf] %v2186_v58 }
 0x379 PF: > { %p16_p8 = scmp.ge.s32.totalorder %s2760_s13, 7   ;;  %s3306_s30 = smov %s2687_s10 }
 0x37a   : > { %s3307_s10 = smov %s2768_s16  ;;  %s3308_s11 = smov %s2760_s13 }
 0x37b   :  { %18 = sbr.rel (!%p16_p8) target bundleno = 2 (0x2), region = 151 }

</bundles_post_ra>
